<compile_context>
chip_gen: v7x
topology: tpu7x:2x2x1
jax: 0.10.0
libtpu: 0.0.40
codegen_flags: <defaults>
</compile_context>

<pallas_src>
import math
import functools

import jax
import jax.numpy as jnp
from jax.experimental import pallas as pl
from jax.experimental.pallas import tpu as pltpu


def _round_up(x, m):
    return (x + m - 1) // m * m


def _pick_tile(n, candidates=(2048, 1024, 512, 256, 128)):
    for c in candidates:
        if c <= n and n % c == 0:
            return c
    return n


def _vmem_limit_bytes():
    """Per-generation scoped-VMEM request (don't hard-code 64 MiB)."""
    try:
        cap = int(pltpu.get_tpu_info().vmem_capacity_bytes)
    except Exception:
        return 48 * 1024 * 1024           # conservative: safe on every generation
    if cap <= 64 * 1024 * 1024:           # v7x: 64 MiB physical per TC
        return 48 * 1024 * 1024
    return 100 * 1024 * 1024              # v5e / v6e: 128 MiB physical


# ----------------------------- Pallas kernels ------------------------------

def _layer_norm_masked(x, gamma, beta, col_mask, n_real, eps=1e-5):
    """LayerNorm over the last dim where columns >= n_real are zero padding.

    Mean-centered (two-pass) variance in f32 (review correctness note)."""
    xm = jnp.where(col_mask, x, 0.0)
    mu = jnp.sum(xm, axis=-1, keepdims=True) / n_real
    diff = jnp.where(col_mask, x - mu, 0.0)
    var = jnp.sum(diff * diff, axis=-1, keepdims=True) / n_real
    return diff * jax.lax.rsqrt(var + eps) * gamma + beta


def transformer_stack_kernel(x_ref,
                             wqkv_ref, bqkv_ref, wo_ref, bo_ref,
                             g1_ref, be1_ref,
                             w1_ref, b1_ref, w2_ref, b2_ref,
                             g2_ref, be2_ref,
                             o_ref,
                             x_acc, ctx_acc,
                             *, num_heads, d_k, d_real, batch, sp):
    """All transformer layers, all batch elements; grid = (L,)."""
    layer = pl.program_id(0)

    @pl.when(layer == 0)
    def _():
        x_acc[...] = x_ref[...]
        ctx_acc[...] = jnp.zeros_like(ctx_acc)   # padded cols stay zero forever

    x = x_acc[...]                               # (B*Sp, Dp) f32 residual stream
    rows, Dp = x.shape
    scale = 1.0 / math.sqrt(d_k)
    col_mask = jax.lax.broadcasted_iota(jnp.int32, (1, Dp), 1) < d_real

    # fused QKV projection in the natural (Dp, 3*Dp) layout (no per-head
    # padding); bf16 on the MXU, f32 accumulation, result cast to bf16 at once.
    xb = x.astype(jnp.bfloat16)
    qkv = (jnp.dot(xb, wqkv_ref[0], preferred_element_type=jnp.float32)
           + bqkv_ref[0]).astype(jnp.bfloat16)   # (B*Sp, 3*Dp) bf16

    # causal mask: key position j must be <= query position i (per sequence)
    row_i = jax.lax.broadcasted_iota(jnp.int32, (sp, sp), 0)
    col_i = jax.lax.broadcasted_iota(jnp.int32, (sp, sp), 1)
    allowed = col_i <= row_i

    # Per-(batch, head) attention with static slices of the fused QKV result.
    # TODO(synk): for many heads use lax.fori_loop with 128-aligned head slots
    # (bounds live ranges); for long sequences add flash-style online-softmax
    # KV tiling and tile w1/w2 over Fp for v7x's 64 MiB VMEM.
    for b in range(batch):
        r0 = b * sp
        for h in range(num_heads):
            lo = h * d_k
            qh = qkv[r0:r0 + sp, lo:lo + d_k]
            kh = qkv[r0:r0 + sp, Dp + lo:Dp + lo + d_k]
            vh = qkv[r0:r0 + sp, 2 * Dp + lo:2 * Dp + lo + d_k]
            s = jax.lax.dot_general(qh, kh, (((1,), (1,)), ((), ())),
                                    preferred_element_type=jnp.float32) * scale
            s = jnp.where(allowed, s, -jnp.inf)
            s = s - jnp.max(s, axis=-1, keepdims=True)
            e = jnp.exp(s)
            inv = pl.reciprocal(jnp.sum(e, axis=-1, keepdims=True), approx=True)
            attn = (e * inv).astype(jnp.bfloat16)
            ctx_acc[r0:r0 + sp, lo:lo + d_k] = jnp.dot(
                attn, vh, preferred_element_type=jnp.float32).astype(jnp.bfloat16)

    # attention output projection (natural (Dp, Dp) WO, bf16 context)
    attn_out = jnp.dot(ctx_acc[...], wo_ref[0],
                       preferred_element_type=jnp.float32) + bo_ref[0]

    # residual + LayerNorm 1 (f32 statistics over the real d_model columns)
    x = _layer_norm_masked(x + attn_out, g1_ref[0], be1_ref[0], col_mask, d_real)

    # feed-forward (bf16 MXU matmuls, f32 accumulation)
    h1 = jnp.dot(x.astype(jnp.bfloat16), w1_ref[0],
                 preferred_element_type=jnp.float32) + b1_ref[0]
    h1 = jnp.maximum(h1, 0.0)
    ff = jnp.dot(h1.astype(jnp.bfloat16), w2_ref[0],
                 preferred_element_type=jnp.float32) + b2_ref[0]

    # residual + LayerNorm 2
    x = _layer_norm_masked(x + ff, g2_ref[0], be2_ref[0], col_mask, d_real)
    x_acc[...] = x

    @pl.when(layer == pl.num_programs(0) - 1)
    def _():
        o_ref[...] = x.astype(o_ref.dtype)       # emit bf16 for the vocab proj


def fc_out_kernel(x_ref, w_ref, b_ref, o_ref):
    """Vocab projection; one vocab tile per grid point; bf16 in, f32 out."""
    o_ref[...] = (jnp.dot(x_ref[...], w_ref[...],
                          preferred_element_type=jnp.float32) + b_ref[...])


# ------------------------------- wrappers -----------------------------------

def run_transformer_stack(x, pk, *, batch, sp, vmem_limit):
    R, Dp = x.shape
    L = pk["wqkv"].shape[0]

    def wmap(shape):
        return pl.BlockSpec((1,) + shape[1:], lambda l: (l, 0, 0))

    kernel = functools.partial(
        transformer_stack_kernel,
        num_heads=pk["H"], d_k=pk["d_k"], d_real=pk["D"], batch=batch, sp=sp)

    weights = [pk[k] for k in ("wqkv", "bqkv", "wo", "bo", "g1", "be1",
                               "w1", "b1", "w2", "b2", "g2", "be2")]
    return pl.pallas_call(
        kernel,
        out_shape=jax.ShapeDtypeStruct((R, Dp), jnp.bfloat16),
        grid=(L,),
        in_specs=[pl.BlockSpec((R, Dp), lambda l: (0, 0))]
                 + [wmap(w.shape) for w in weights],
        out_specs=pl.BlockSpec((R, Dp), lambda l: (0, 0)),
        scratch_shapes=[pltpu.VMEM((R, Dp), jnp.float32),     # residual stream
                        pltpu.VMEM((R, Dp), jnp.bfloat16)],   # head contexts
        compiler_params=pltpu.CompilerParams(
            dimension_semantics=("arbitrary",),
            vmem_limit_bytes=vmem_limit),
    )(x, *weights)


def run_fc_out(x, fc_w, fc_b, vmem_limit):
    R, Dp = x.shape
    Vp = fc_w.shape[1]
    TV = _pick_tile(Vp)
    return pl.pallas_call(
        fc_out_kernel,
        out_shape=jax.ShapeDtypeStruct((R, Vp), jnp.float32),
        grid=(Vp // TV,),
        in_specs=[pl.BlockSpec((R, Dp), lambda j: (0, 0)),
                  pl.BlockSpec((Dp, TV), lambda j: (0, j)),
                  pl.BlockSpec((1, TV), lambda j: (0, j))],
        out_specs=pl.BlockSpec((R, TV), lambda j: (0, j)),
        compiler_params=pltpu.CompilerParams(
            dimension_semantics=("parallel",),
            vmem_limit_bytes=vmem_limit),
    )(x, fc_w, fc_b)


# --------------------------- parameter packing -------------------------------

def pack_params(params, num_heads):
    """Pad only d_model/d_ff/vocab to 128-aligned lane widths (NO per-head
    padding), stack per-layer weights, cast matmul weights to bf16 once."""
    emb = params["embedding"]
    D = emb.shape[1]
    V = params["fc_out_w"].shape[1]
    F = params["blocks"][0]["w1"].shape[1]
    H = num_heads
    assert D % H == 0
    d_k = D // H
    Dp = _round_up(D, 128)
    Fp = _round_up(F, 128)
    Vp = _round_up(V, 128)
    bf16 = jnp.bfloat16

    def pad2(w, r, c):
        return jnp.pad(w, ((0, r - w.shape[0]), (0, c - w.shape[1])))

    def pad_vec(v, n):
        return jnp.pad(v, (0, n - v.shape[0]))[None, :]            # (1, n)

    blocks = params["blocks"]
    wqkv = jnp.stack([jnp.concatenate(
        [pad2(p["wq"], Dp, Dp), pad2(p["wk"], Dp, Dp), pad2(p["wv"], Dp, Dp)],
        axis=1) for p in blocks]).astype(bf16)                      # (L, Dp, 3*Dp)
    bqkv = jnp.stack([jnp.concatenate(
        [pad_vec(p["bq"], Dp), pad_vec(p["bk"], Dp), pad_vec(p["bv"], Dp)],
        axis=1) for p in blocks])                                   # (L, 1, 3*Dp)

    return {
        "embedding": emb,
        "D": D, "V": V, "H": H, "d_k": d_k, "Dp": Dp, "Fp": Fp, "Vp": Vp,
        "wqkv": wqkv, "bqkv": bqkv,
        "wo": jnp.stack([pad2(p["wo"], Dp, Dp) for p in blocks]).astype(bf16),
        "bo": jnp.stack([pad_vec(p["bo"], Dp) for p in blocks]),
        "g1": jnp.stack([pad_vec(p["g1"], Dp) for p in blocks]),
        "be1": jnp.stack([pad_vec(p["be1"], Dp) for p in blocks]),
        "w1": jnp.stack([pad2(p["w1"], Dp, Fp) for p in blocks]).astype(bf16),
        "b1": jnp.stack([pad_vec(p["b1"], Fp) for p in blocks]),
        "w2": jnp.stack([pad2(p["w2"], Fp, Dp) for p in blocks]).astype(bf16),
        "b2": jnp.stack([pad_vec(p["b2"], Dp) for p in blocks]),
        "g2": jnp.stack([pad_vec(p["g2"], Dp) for p in blocks]),
        "be2": jnp.stack([pad_vec(p["be2"], Dp) for p in blocks]),
        "fc_w": pad2(params["fc_out_w"], Dp, Vp).astype(bf16),      # (Dp, Vp)
        "fc_b": pad_vec(params["fc_out_b"], Vp),                    # (1, Vp)
    }


# --------------------------- model construction -----------------------------

def make_positional_encoding(d_model, max_seq_length):
    position = jnp.arange(max_seq_length, dtype=jnp.float32)[:, None]
    div_term = jnp.exp(jnp.arange(0, d_model, 2, dtype=jnp.float32)
                       * (-math.log(10000.0) / d_model))
    pe = jnp.zeros((max_seq_length, d_model), dtype=jnp.float32)
    pe = pe.at[:, 0::2].set(jnp.sin(position * div_term))
    pe = pe.at[:, 1::2].set(jnp.cos(position * div_term))
    return pe


def init_params(key, vocab_size, d_model, num_layers, d_ff):
    def nrm(k, shape):
        return 0.02 * jax.random.normal(k, shape, dtype=jnp.float32)

    keys = jax.random.split(key, 2 + num_layers)
    params = {
        "embedding": nrm(keys[0], (vocab_size, d_model)),
        "fc_out_w": nrm(keys[1], (d_model, vocab_size)),
        "fc_out_b": jnp.zeros((vocab_size,), jnp.float32),
        "blocks": [],
    }
    for l in range(num_layers):
        ks = jax.random.split(keys[2 + l], 6)
        blk = {
            "wq": nrm(ks[0], (d_model, d_model)), "bq": jnp.zeros((d_model,), jnp.float32),
            "wk": nrm(ks[1], (d_model, d_model)), "bk": jnp.zeros((d_model,), jnp.float32),
            "wv": nrm(ks[2], (d_model, d_model)), "bv": jnp.zeros((d_model,), jnp.float32),
            "wo": nrm(ks[3], (d_model, d_model)), "bo": jnp.zeros((d_model,), jnp.float32),
            "g1": jnp.ones((d_model,), jnp.float32), "be1": jnp.zeros((d_model,), jnp.float32),
            "w1": nrm(ks[4], (d_model, d_ff)), "b1": jnp.zeros((d_ff,), jnp.float32),
            "w2": nrm(ks[5], (d_ff, d_model)), "b2": jnp.zeros((d_model,), jnp.float32),
            "g2": jnp.ones((d_model,), jnp.float32), "be2": jnp.zeros((d_model,), jnp.float32),
        }
        params["blocks"].append(blk)
    return params


def dialogue_llm_forward(packed, token_ids, pe):
    # glue: embedding lookup + positional encoding (dropout = identity, eval)
    B, S = token_ids.shape
    D, V, Dp = packed["D"], packed["V"], packed["Dp"]
    Sp = _round_up(S, 16)                          # bf16 sublane-friendly rows

    x = packed["embedding"][token_ids] + pe[:S]    # (B, S, D)
    x = jnp.pad(x, ((0, 0), (0, Sp - S), (0, Dp - D)))
    x = x.reshape(B * Sp, Dp)                      # fold batch: weights stream once

    vmem_limit = _vmem_limit_bytes()
    xo = run_transformer_stack(x, packed, batch=B, sp=Sp, vmem_limit=vmem_limit)
    logits = run_fc_out(xo, packed["fc_w"], packed["fc_b"], vmem_limit)
    logits = logits.reshape(B, Sp, -1)
    return logits[:, :S, :V]


# ------------------------------ JAX reference --------------------------------

def _layer_norm_ref(x, gamma, beta, eps=1e-5):
    mu = jnp.mean(x, axis=-1, keepdims=True)
    var = jnp.mean((x - mu) ** 2, axis=-1, keepdims=True)
    return (x - mu) * jax.lax.rsqrt(var + eps) * gamma + beta


def reference_forward(params, token_ids, pe, num_heads):
    x = params["embedding"][token_ids]
    B, S, D = x.shape
    d_k = D // num_heads
    x = x + pe[:S]
    mask = jnp.tril(jnp.ones((S, S), bool))
    for p in params["blocks"]:
        q = x @ p["wq"] + p["bq"]
        k = x @ p["wk"] + p["bk"]
        v = x @ p["wv"] + p["bv"]
        q = q.reshape(B, S, num_heads, d_k).transpose(0, 2, 1, 3)
        k = k.reshape(B, S, num_heads, d_k).transpose(0, 2, 1, 3)
        v = v.reshape(B, S, num_heads, d_k).transpose(0, 2, 1, 3)
        s = jnp.einsum("bhqd,bhkd->bhqk", q, k) / math.sqrt(d_k)
        s = jnp.where(mask, s, -jnp.inf)
        a = jax.nn.softmax(s, axis=-1)
        o = jnp.einsum("bhqk,bhkd->bhqd", a, v).transpose(0, 2, 1, 3).reshape(B, S, D)
        o = o @ p["wo"] + p["bo"]
        x = _layer_norm_ref(x + o, p["g1"], p["be1"])
        ff = jnp.maximum(x @ p["w1"] + p["b1"], 0.0) @ p["w2"] + p["b2"]
        x = _layer_norm_ref(x + ff, p["g2"], p["be2"])
    return x @ params["fc_out_w"] + params["fc_out_b"]


# ---------------------------------- main -------------------------------------

if __name__ == "__main__":
    vocab_size = 64
    d_model = 32
    num_heads = 4
    num_layers = 2
    d_ff = 64
    max_seq_length = 16
    B, S = 2, 8

    key = jax.random.PRNGKey(0)
    k_param, k_tok = jax.random.split(key)
    params = init_params(k_param, vocab_size, d_model, num_layers, d_ff)
    pe = make_positional_encoding(d_model, max_seq_length)
    token_ids = jax.random.randint(k_tok, (B, S), 0, vocab_size, dtype=jnp.int32)

    packed = pack_params(params, num_heads)
    logits = dialogue_llm_forward(packed, token_ids, pe)
    logits = jax.block_until_ready(logits)

    ref = reference_forward(params, token_ids, pe, num_heads)
    assert logits.shape == (B, S, vocab_size)
    # bf16 MXU matmuls + bf16 activations vs an f32 reference: bf16-level tol.
    assert jnp.allclose(logits, ref, atol=2e-2, rtol=2e-2), "mismatch vs JAX reference"

    # TODO(synk): dropout is inference-mode identity; training-mode RNG dropout
    # (pltpu.prng_random_bits) not implemented.
    print("KERNEL_OK")
</pallas_src>

<mosaic_0001>
module attributes {stable_mosaic.version = 11 : i64} {
  func.func @transformer_stack_kernel(%arg0: i32, %arg1: memref<32x128xf32, #tpu.memory_space<vmem>>, %arg2: memref<1x128x384xbf16, #tpu.memory_space<vmem>>, %arg3: memref<1x1x384xf32, #tpu.memory_space<vmem>>, %arg4: memref<1x128x128xbf16, #tpu.memory_space<vmem>>, %arg5: memref<1x1x128xf32, #tpu.memory_space<vmem>>, %arg6: memref<1x1x128xf32, #tpu.memory_space<vmem>>, %arg7: memref<1x1x128xf32, #tpu.memory_space<vmem>>, %arg8: memref<1x128x128xbf16, #tpu.memory_space<vmem>>, %arg9: memref<1x1x128xf32, #tpu.memory_space<vmem>>, %arg10: memref<1x128x128xbf16, #tpu.memory_space<vmem>>, %arg11: memref<1x1x128xf32, #tpu.memory_space<vmem>>, %arg12: memref<1x1x128xf32, #tpu.memory_space<vmem>>, %arg13: memref<1x1x128xf32, #tpu.memory_space<vmem>>, %arg14: memref<32x128xbf16, #tpu.memory_space<vmem>>, %arg15: memref<32x128xf32, #tpu.memory_space<vmem>>, %arg16: memref<32x128xbf16, #tpu.memory_space<vmem>>) attributes {dimension_semantics = [#tpu.dimension_semantics<arbitrary>], iteration_bounds = array<i64: 2>, scalar_prefetch = 0 : i64, scratch_operands = 2 : i64, tpu.core_type = #tpu.core_type<tc>, window_params = [{pipeline_mode = #tpu.pipeline_mode<synchronous>, transform_indices = @transform_0, window_bounds = array<i64: 32, 128>}, {transform_indices = @transform_1, window_bounds = array<i64: 1, 128, 384>}, {transform_indices = @transform_2, window_bounds = array<i64: 1, 1, 384>}, {transform_indices = @transform_3, window_bounds = array<i64: 1, 128, 128>}, {transform_indices = @transform_4, window_bounds = array<i64: 1, 1, 128>}, {transform_indices = @transform_5, window_bounds = array<i64: 1, 1, 128>}, {transform_indices = @transform_6, window_bounds = array<i64: 1, 1, 128>}, {transform_indices = @transform_7, window_bounds = array<i64: 1, 128, 128>}, {transform_indices = @transform_8, window_bounds = array<i64: 1, 1, 128>}, {transform_indices = @transform_9, window_bounds = array<i64: 1, 128, 128>}, {transform_indices = @transform_10, window_bounds = array<i64: 1, 1, 128>}, {transform_indices = @transform_11, window_bounds = array<i64: 1, 1, 128>}, {transform_indices = @transform_12, window_bounds = array<i64: 1, 1, 128>}, {pipeline_mode = #tpu.pipeline_mode<synchronous>, transform_indices = @transform_13, window_bounds = array<i64: 32, 128>}]} {
    %c0_i32 = arith.constant 0 : i32
    %0 = arith.cmpi eq, %arg0, %c0_i32 : i32
    %1 = arith.extui %0 : i1 to i32
    %c0_i32_0 = arith.constant 0 : i32
    %2 = arith.cmpi ne, %1, %c0_i32_0 : i32
    scf.if %2 {
      %c0_122 = arith.constant 0 : index
      %c0_123 = arith.constant 0 : index
      %291 = vector.load %arg1[%c0_122, %c0_123] : memref<32x128xf32, #tpu.memory_space<vmem>>, vector<32x128xf32>
      %c0_124 = arith.constant 0 : index
      %c0_125 = arith.constant 0 : index
      %292 = vector.load %arg15[%c0_124, %c0_125] : memref<32x128xf32, #tpu.memory_space<vmem>>, vector<32x128xf32>
      tpu.vector_store %arg15[%c0_124, %c0_125], %291 {strides = array<i32>} : memref<32x128xf32, #tpu.memory_space<vmem>>, vector<32x128xf32>,
      %cst_126 = arith.constant 0.000000e+00 : bf16
      %293 = vector.broadcast %cst_126 : bf16 to vector<32x128xbf16>
      %c0_127 = arith.constant 0 : index
      %c0_128 = arith.constant 0 : index
      %294 = vector.load %arg16[%c0_127, %c0_128] : memref<32x128xbf16, #tpu.memory_space<vmem>>, vector<32x128xbf16>
      tpu.vector_store %arg16[%c0_127, %c0_128], %293 {strides = array<i32>} : memref<32x128xbf16, #tpu.memory_space<vmem>>, vector<32x128xbf16>,
    } else {
    }
    %c0 = arith.constant 0 : index
    %c0_1 = arith.constant 0 : index
    %3 = vector.load %arg15[%c0, %c0_1] : memref<32x128xf32, #tpu.memory_space<vmem>>, vector<32x128xf32>
    %4 = tpu.iota {dimensions = array<i32: 1>} : vector<1x128xi32>
    %c32_i32 = arith.constant 32 : i32
    %5 = vector.broadcast %c32_i32 : i32 to vector<1x128xi32>
    %6 = arith.cmpi slt, %4, %5 : vector<1x128xi32>
    %7 = arith.truncf %3 : vector<32x128xf32> to vector<32x128xbf16>
    %c0_2 = arith.constant 0 : index
    %c0_3 = arith.constant 0 : index
    %c0_4 = arith.constant 0 : index
    %8 = vector.load %arg2[%c0_2, %c0_3, %c0_4] : memref<1x128x384xbf16, #tpu.memory_space<vmem>>, vector<1x128x384xbf16>
    %9 = vector.shape_cast %8 : vector<1x128x384xbf16> to vector<128x384xbf16>
    %cst = arith.constant dense<0.000000e+00> : vector<32x384xf32>
    %10 = tpu.matmul %7, %9, %cst {dimension_numbers = #tpu.dot_dimension_numbers<[1], [0], [0], [1], [0, 0, 1, 1], [], []>} : vector<32x128xbf16>, vector<128x384xbf16>, vector<32x384xf32> -> vector<32x384xf32>
    %c0_5 = arith.constant 0 : index
    %c0_6 = arith.constant 0 : index
    %c0_7 = arith.constant 0 : index
    %11 = vector.load %arg3[%c0_5, %c0_6, %c0_7] : memref<1x1x384xf32, #tpu.memory_space<vmem>>, vector<1x1x384xf32>
    %12 = vector.shape_cast %11 : vector<1x1x384xf32> to vector<1x384xf32>
    %13 = vector.broadcast %12 : vector<1x384xf32> to vector<32x384xf32>
    %14 = arith.addf %10, %13 : vector<32x384xf32>
    %15 = arith.truncf %14 : vector<32x384xf32> to vector<32x384xbf16>
    %16 = tpu.iota {dimensions = array<i32: 0>} : vector<16x16xi32>
    %17 = tpu.iota {dimensions = array<i32: 1>} : vector<16x16xi32>
    %18 = arith.cmpi sle, %17, %16 : vector<16x16xi32>
    %19 = vector.extract_strided_slice %15 {offsets = [0, 0], sizes = [16, 8], strides = [1, 1]} : vector<32x384xbf16> to vector<16x8xbf16>
    %20 = vector.extract_strided_slice %15 {offsets = [0, 128], sizes = [16, 8], strides = [1, 1]} : vector<32x384xbf16> to vector<16x8xbf16>
    %21 = vector.extract_strided_slice %15 {offsets = [0, 256], sizes = [16, 8], strides = [1, 1]} : vector<32x384xbf16> to vector<16x8xbf16>
    %cst_8 = arith.constant dense<0.000000e+00> : vector<16x16xf32>
    %22 = tpu.matmul %19, %20, %cst_8 {dimension_numbers = #tpu.dot_dimension_numbers<[1], [1], [0], [0], [0, 0, 1, 0], [], []>} : vector<16x8xbf16>, vector<16x8xbf16>, vector<16x16xf32> -> vector<16x16xf32>
    %cst_9 = arith.constant 0.353553385 : f32
    %23 = vector.broadcast %cst_9 : f32 to vector<16x16xf32>
    %24 = arith.mulf %22, %23 : vector<16x16xf32>
    %cst_10 = arith.constant 0xFF800000 : f32
    %25 = vector.broadcast %cst_10 : f32 to vector<16x16xf32>
    %26 = arith.select %18, %24, %25 : vector<16x16xi1>, vector<16x16xf32>
    %cst_11 = arith.constant dense<0xFF800000> : vector<16xf32>
    %27 = vector.multi_reduction <maximumf>, %26, %cst_11 [1] : vector<16x16xf32> to vector<16xf32>
    %28 = vector.shape_cast %27 : vector<16xf32> to vector<16x1xf32>
    %29 = vector.broadcast %28 : vector<16x1xf32> to vector<16x16xf32>
    %30 = arith.subf %26, %29 : vector<16x16xf32>
    %31 = math.exp %30 : vector<16x16xf32>
    %cst_12 = arith.constant dense<0.000000e+00> : vector<16xf32>
    %32 = vector.multi_reduction <add>, %31, %cst_12 [1] : vector<16x16xf32> to vector<16xf32>
    %33 = vector.shape_cast %32 : vector<16xf32> to vector<16x1xf32>
    %34 = tpu.reciprocal %33 {approx = true} : vector<16x1xf32> -> vector<16x1xf32>
    %35 = vector.broadcast %34 : vector<16x1xf32> to vector<16x16xf32>
    %36 = arith.mulf %31, %35 : vector<16x16xf32>
    %37 = arith.truncf %36 : vector<16x16xf32> to vector<16x16xbf16>
    %cst_13 = arith.constant dense<0.000000e+00> : vector<16x8xf32>
    %38 = tpu.matmul %37, %21, %cst_13 {dimension_numbers = #tpu.dot_dimension_numbers<[1], [0], [0], [1], [0, 0, 1, 1], [], []>} : vector<16x16xbf16>, vector<16x8xbf16>, vector<16x8xf32> -> vector<16x8xf32>
    %39 = arith.truncf %38 : vector<16x8xf32> to vector<16x8xbf16>
    %c0_14 = arith.constant 0 : index
    %c0_15 = arith.constant 0 : index
    %40 = vector.load %arg16[%c0_14, %c0_15] : memref<32x128xbf16, #tpu.memory_space<vmem>>, vector<16x8xbf16>
    tpu.vector_store %arg16[%c0_14, %c0_15], %39 {strides = array<i32>} : memref<32x128xbf16, #tpu.memory_space<vmem>>, vector<16x8xbf16>,
    %41 = vector.extract_strided_slice %15 {offsets = [0, 8], sizes = [16, 8], strides = [1, 1]} : vector<32x384xbf16> to vector<16x8xbf16>
    %42 = vector.extract_strided_slice %15 {offsets = [0, 136], sizes = [16, 8], strides = [1, 1]} : vector<32x384xbf16> to vector<16x8xbf16>
    %43 = vector.extract_strided_slice %15 {offsets = [0, 264], sizes = [16, 8], strides = [1, 1]} : vector<32x384xbf16> to vector<16x8xbf16>
    %cst_16 = arith.constant dense<0.000000e+00> : vector<16x16xf32>
    %44 = tpu.matmul %41, %42, %cst_16 {dimension_numbers = #tpu.dot_dimension_numbers<[1], [1], [0], [0], [0, 0, 1, 0], [], []>} : vector<16x8xbf16>, vector<16x8xbf16>, vector<16x16xf32> -> vector<16x16xf32>
    %cst_17 = arith.constant 0.353553385 : f32
    %45 = vector.broadcast %cst_17 : f32 to vector<16x16xf32>
    %46 = arith.mulf %44, %45 : vector<16x16xf32>
    %cst_18 = arith.constant 0xFF800000 : f32
    %47 = vector.broadcast %cst_18 : f32 to vector<16x16xf32>
    %48 = arith.select %18, %46, %47 : vector<16x16xi1>, vector<16x16xf32>
    %cst_19 = arith.constant dense<0xFF800000> : vector<16xf32>
    %49 = vector.multi_reduction <maximumf>, %48, %cst_19 [1] : vector<16x16xf32> to vector<16xf32>
    %50 = vector.shape_cast %49 : vector<16xf32> to vector<16x1xf32>
    %51 = vector.broadcast %50 : vector<16x1xf32> to vector<16x16xf32>
    %52 = arith.subf %48, %51 : vector<16x16xf32>
    %53 = math.exp %52 : vector<16x16xf32>
    %cst_20 = arith.constant dense<0.000000e+00> : vector<16xf32>
    %54 = vector.multi_reduction <add>, %53, %cst_20 [1] : vector<16x16xf32> to vector<16xf32>
    %55 = vector.shape_cast %54 : vector<16xf32> to vector<16x1xf32>
    %56 = tpu.reciprocal %55 {approx = true} : vector<16x1xf32> -> vector<16x1xf32>
    %57 = vector.broadcast %56 : vector<16x1xf32> to vector<16x16xf32>
    %58 = arith.mulf %53, %57 : vector<16x16xf32>
    %59 = arith.truncf %58 : vector<16x16xf32> to vector<16x16xbf16>
    %cst_21 = arith.constant dense<0.000000e+00> : vector<16x8xf32>
    %60 = tpu.matmul %59, %43, %cst_21 {dimension_numbers = #tpu.dot_dimension_numbers<[1], [0], [0], [1], [0, 0, 1, 1], [], []>} : vector<16x16xbf16>, vector<16x8xbf16>, vector<16x8xf32> -> vector<16x8xf32>
    %61 = arith.truncf %60 : vector<16x8xf32> to vector<16x8xbf16>
    %c0_22 = arith.constant 0 : index
    %c8 = arith.constant 8 : index
    %62 = vector.load %arg16[%c0_22, %c8] : memref<32x128xbf16, #tpu.memory_space<vmem>>, vector<16x8xbf16>
    tpu.vector_store %arg16[%c0_22, %c8], %61 {strides = array<i32>} : memref<32x128xbf16, #tpu.memory_space<vmem>>, vector<16x8xbf16>,
    %63 = vector.extract_strided_slice %15 {offsets = [0, 16], sizes = [16, 8], strides = [1, 1]} : vector<32x384xbf16> to vector<16x8xbf16>
    %64 = vector.extract_strided_slice %15 {offsets = [0, 144], sizes = [16, 8], strides = [1, 1]} : vector<32x384xbf16> to vector<16x8xbf16>
    %65 = vector.extract_strided_slice %15 {offsets = [0, 272], sizes = [16, 8], strides = [1, 1]} : vector<32x384xbf16> to vector<16x8xbf16>
    %cst_23 = arith.constant dense<0.000000e+00> : vector<16x16xf32>
    %66 = tpu.matmul %63, %64, %cst_23 {dimension_numbers = #tpu.dot_dimension_numbers<[1], [1], [0], [0], [0, 0, 1, 0], [], []>} : vector<16x8xbf16>, vector<16x8xbf16>, vector<16x16xf32> -> vector<16x16xf32>
    %cst_24 = arith.constant 0.353553385 : f32
    %67 = vector.broadcast %cst_24 : f32 to vector<16x16xf32>
    %68 = arith.mulf %66, %67 : vector<16x16xf32>
    %cst_25 = arith.constant 0xFF800000 : f32
    %69 = vector.broadcast %cst_25 : f32 to vector<16x16xf32>
    %70 = arith.select %18, %68, %69 : vector<16x16xi1>, vector<16x16xf32>
    %cst_26 = arith.constant dense<0xFF800000> : vector<16xf32>
    %71 = vector.multi_reduction <maximumf>, %70, %cst_26 [1] : vector<16x16xf32> to vector<16xf32>
    %72 = vector.shape_cast %71 : vector<16xf32> to vector<16x1xf32>
    %73 = vector.broadcast %72 : vector<16x1xf32> to vector<16x16xf32>
    %74 = arith.subf %70, %73 : vector<16x16xf32>
    %75 = math.exp %74 : vector<16x16xf32>
    %cst_27 = arith.constant dense<0.000000e+00> : vector<16xf32>
    %76 = vector.multi_reduction <add>, %75, %cst_27 [1] : vector<16x16xf32> to vector<16xf32>
    %77 = vector.shape_cast %76 : vector<16xf32> to vector<16x1xf32>
    %78 = tpu.reciprocal %77 {approx = true} : vector<16x1xf32> -> vector<16x1xf32>
    %79 = vector.broadcast %78 : vector<16x1xf32> to vector<16x16xf32>
    %80 = arith.mulf %75, %79 : vector<16x16xf32>
    %81 = arith.truncf %80 : vector<16x16xf32> to vector<16x16xbf16>
    %cst_28 = arith.constant dense<0.000000e+00> : vector<16x8xf32>
    %82 = tpu.matmul %81, %65, %cst_28 {dimension_numbers = #tpu.dot_dimension_numbers<[1], [0], [0], [1], [0, 0, 1, 1], [], []>} : vector<16x16xbf16>, vector<16x8xbf16>, vector<16x8xf32> -> vector<16x8xf32>
    %83 = arith.truncf %82 : vector<16x8xf32> to vector<16x8xbf16>
    %c0_29 = arith.constant 0 : index
    %c16 = arith.constant 16 : index
    %84 = vector.load %arg16[%c0_29, %c16] : memref<32x128xbf16, #tpu.memory_space<vmem>>, vector<16x8xbf16>
    tpu.vector_store %arg16[%c0_29, %c16], %83 {strides = array<i32>} : memref<32x128xbf16, #tpu.memory_space<vmem>>, vector<16x8xbf16>,
    %85 = vector.extract_strided_slice %15 {offsets = [0, 24], sizes = [16, 8], strides = [1, 1]} : vector<32x384xbf16> to vector<16x8xbf16>
    %86 = vector.extract_strided_slice %15 {offsets = [0, 152], sizes = [16, 8], strides = [1, 1]} : vector<32x384xbf16> to vector<16x8xbf16>
    %87 = vector.extract_strided_slice %15 {offsets = [0, 280], sizes = [16, 8], strides = [1, 1]} : vector<32x384xbf16> to vector<16x8xbf16>
    %cst_30 = arith.constant dense<0.000000e+00> : vector<16x16xf32>
    %88 = tpu.matmul %85, %86, %cst_30 {dimension_numbers = #tpu.dot_dimension_numbers<[1], [1], [0], [0], [0, 0, 1, 0], [], []>} : vector<16x8xbf16>, vector<16x8xbf16>, vector<16x16xf32> -> vector<16x16xf32>
    %cst_31 = arith.constant 0.353553385 : f32
    %89 = vector.broadcast %cst_31 : f32 to vector<16x16xf32>
    %90 = arith.mulf %88, %89 : vector<16x16xf32>
    %cst_32 = arith.constant 0xFF800000 : f32
    %91 = vector.broadcast %cst_32 : f32 to vector<16x16xf32>
    %92 = arith.select %18, %90, %91 : vector<16x16xi1>, vector<16x16xf32>
    %cst_33 = arith.constant dense<0xFF800000> : vector<16xf32>
    %93 = vector.multi_reduction <maximumf>, %92, %cst_33 [1] : vector<16x16xf32> to vector<16xf32>
    %94 = vector.shape_cast %93 : vector<16xf32> to vector<16x1xf32>
    %95 = vector.broadcast %94 : vector<16x1xf32> to vector<16x16xf32>
    %96 = arith.subf %92, %95 : vector<16x16xf32>
    %97 = math.exp %96 : vector<16x16xf32>
    %cst_34 = arith.constant dense<0.000000e+00> : vector<16xf32>
    %98 = vector.multi_reduction <add>, %97, %cst_34 [1] : vector<16x16xf32> to vector<16xf32>
    %99 = vector.shape_cast %98 : vector<16xf32> to vector<16x1xf32>
    %100 = tpu.reciprocal %99 {approx = true} : vector<16x1xf32> -> vector<16x1xf32>
    %101 = vector.broadcast %100 : vector<16x1xf32> to vector<16x16xf32>
    %102 = arith.mulf %97, %101 : vector<16x16xf32>
    %103 = arith.truncf %102 : vector<16x16xf32> to vector<16x16xbf16>
    %cst_35 = arith.constant dense<0.000000e+00> : vector<16x8xf32>
    %104 = tpu.matmul %103, %87, %cst_35 {dimension_numbers = #tpu.dot_dimension_numbers<[1], [0], [0], [1], [0, 0, 1, 1], [], []>} : vector<16x16xbf16>, vector<16x8xbf16>, vector<16x8xf32> -> vector<16x8xf32>
    %105 = arith.truncf %104 : vector<16x8xf32> to vector<16x8xbf16>
    %c0_36 = arith.constant 0 : index
    %c24 = arith.constant 24 : index
    %106 = vector.load %arg16[%c0_36, %c24] : memref<32x128xbf16, #tpu.memory_space<vmem>>, vector<16x8xbf16>
    tpu.vector_store %arg16[%c0_36, %c24], %105 {strides = array<i32>} : memref<32x128xbf16, #tpu.memory_space<vmem>>, vector<16x8xbf16>,
    %107 = vector.extract_strided_slice %15 {offsets = [16, 0], sizes = [16, 8], strides = [1, 1]} : vector<32x384xbf16> to vector<16x8xbf16>
    %108 = vector.extract_strided_slice %15 {offsets = [16, 128], sizes = [16, 8], strides = [1, 1]} : vector<32x384xbf16> to vector<16x8xbf16>
    %109 = vector.extract_strided_slice %15 {offsets = [16, 256], sizes = [16, 8], strides = [1, 1]} : vector<32x384xbf16> to vector<16x8xbf16>
    %cst_37 = arith.constant dense<0.000000e+00> : vector<16x16xf32>
    %110 = tpu.matmul %107, %108, %cst_37 {dimension_numbers = #tpu.dot_dimension_numbers<[1], [1], [0], [0], [0, 0, 1, 0], [], []>} : vector<16x8xbf16>, vector<16x8xbf16>, vector<16x16xf32> -> vector<16x16xf32>
    %cst_38 = arith.constant 0.353553385 : f32
    %111 = vector.broadcast %cst_38 : f32 to vector<16x16xf32>
    %112 = arith.mulf %110, %111 : vector<16x16xf32>
    %cst_39 = arith.constant 0xFF800000 : f32
    %113 = vector.broadcast %cst_39 : f32 to vector<16x16xf32>
    %114 = arith.select %18, %112, %113 : vector<16x16xi1>, vector<16x16xf32>
    %cst_40 = arith.constant dense<0xFF800000> : vector<16xf32>
    %115 = vector.multi_reduction <maximumf>, %114, %cst_40 [1] : vector<16x16xf32> to vector<16xf32>
    %116 = vector.shape_cast %115 : vector<16xf32> to vector<16x1xf32>
    %117 = vector.broadcast %116 : vector<16x1xf32> to vector<16x16xf32>
    %118 = arith.subf %114, %117 : vector<16x16xf32>
    %119 = math.exp %118 : vector<16x16xf32>
    %cst_41 = arith.constant dense<0.000000e+00> : vector<16xf32>
    %120 = vector.multi_reduction <add>, %119, %cst_41 [1] : vector<16x16xf32> to vector<16xf32>
    %121 = vector.shape_cast %120 : vector<16xf32> to vector<16x1xf32>
    %122 = tpu.reciprocal %121 {approx = true} : vector<16x1xf32> -> vector<16x1xf32>
    %123 = vector.broadcast %122 : vector<16x1xf32> to vector<16x16xf32>
    %124 = arith.mulf %119, %123 : vector<16x16xf32>
    %125 = arith.truncf %124 : vector<16x16xf32> to vector<16x16xbf16>
    %cst_42 = arith.constant dense<0.000000e+00> : vector<16x8xf32>
    %126 = tpu.matmul %125, %109, %cst_42 {dimension_numbers = #tpu.dot_dimension_numbers<[1], [0], [0], [1], [0, 0, 1, 1], [], []>} : vector<16x16xbf16>, vector<16x8xbf16>, vector<16x8xf32> -> vector<16x8xf32>
    %127 = arith.truncf %126 : vector<16x8xf32> to vector<16x8xbf16>
    %c16_43 = arith.constant 16 : index
    %c0_44 = arith.constant 0 : index
    %128 = vector.load %arg16[%c16_43, %c0_44] : memref<32x128xbf16, #tpu.memory_space<vmem>>, vector<16x8xbf16>
    tpu.vector_store %arg16[%c16_43, %c0_44], %127 {strides = array<i32>} : memref<32x128xbf16, #tpu.memory_space<vmem>>, vector<16x8xbf16>,
    %129 = vector.extract_strided_slice %15 {offsets = [16, 8], sizes = [16, 8], strides = [1, 1]} : vector<32x384xbf16> to vector<16x8xbf16>
    %130 = vector.extract_strided_slice %15 {offsets = [16, 136], sizes = [16, 8], strides = [1, 1]} : vector<32x384xbf16> to vector<16x8xbf16>
    %131 = vector.extract_strided_slice %15 {offsets = [16, 264], sizes = [16, 8], strides = [1, 1]} : vector<32x384xbf16> to vector<16x8xbf16>
    %cst_45 = arith.constant dense<0.000000e+00> : vector<16x16xf32>
    %132 = tpu.matmul %129, %130, %cst_45 {dimension_numbers = #tpu.dot_dimension_numbers<[1], [1], [0], [0], [0, 0, 1, 0], [], []>} : vector<16x8xbf16>, vector<16x8xbf16>, vector<16x16xf32> -> vector<16x16xf32>
    %cst_46 = arith.constant 0.353553385 : f32
    %133 = vector.broadcast %cst_46 : f32 to vector<16x16xf32>
    %134 = arith.mulf %132, %133 : vector<16x16xf32>
    %cst_47 = arith.constant 0xFF800000 : f32
    %135 = vector.broadcast %cst_47 : f32 to vector<16x16xf32>
    %136 = arith.select %18, %134, %135 : vector<16x16xi1>, vector<16x16xf32>
    %cst_48 = arith.constant dense<0xFF800000> : vector<16xf32>
    %137 = vector.multi_reduction <maximumf>, %136, %cst_48 [1] : vector<16x16xf32> to vector<16xf32>
    %138 = vector.shape_cast %137 : vector<16xf32> to vector<16x1xf32>
    %139 = vector.broadcast %138 : vector<16x1xf32> to vector<16x16xf32>
    %140 = arith.subf %136, %139 : vector<16x16xf32>
    %141 = math.exp %140 : vector<16x16xf32>
    %cst_49 = arith.constant dense<0.000000e+00> : vector<16xf32>
    %142 = vector.multi_reduction <add>, %141, %cst_49 [1] : vector<16x16xf32> to vector<16xf32>
    %143 = vector.shape_cast %142 : vector<16xf32> to vector<16x1xf32>
    %144 = tpu.reciprocal %143 {approx = true} : vector<16x1xf32> -> vector<16x1xf32>
    %145 = vector.broadcast %144 : vector<16x1xf32> to vector<16x16xf32>
    %146 = arith.mulf %141, %145 : vector<16x16xf32>
    %147 = arith.truncf %146 : vector<16x16xf32> to vector<16x16xbf16>
    %cst_50 = arith.constant dense<0.000000e+00> : vector<16x8xf32>
    %148 = tpu.matmul %147, %131, %cst_50 {dimension_numbers = #tpu.dot_dimension_numbers<[1], [0], [0], [1], [0, 0, 1, 1], [], []>} : vector<16x16xbf16>, vector<16x8xbf16>, vector<16x8xf32> -> vector<16x8xf32>
    %149 = arith.truncf %148 : vector<16x8xf32> to vector<16x8xbf16>
    %c16_51 = arith.constant 16 : index
    %c8_52 = arith.constant 8 : index
    %150 = vector.load %arg16[%c16_51, %c8_52] : memref<32x128xbf16, #tpu.memory_space<vmem>>, vector<16x8xbf16>
    tpu.vector_store %arg16[%c16_51, %c8_52], %149 {strides = array<i32>} : memref<32x128xbf16, #tpu.memory_space<vmem>>, vector<16x8xbf16>,
    %151 = vector.extract_strided_slice %15 {offsets = [16, 16], sizes = [16, 8], strides = [1, 1]} : vector<32x384xbf16> to vector<16x8xbf16>
    %152 = vector.extract_strided_slice %15 {offsets = [16, 144], sizes = [16, 8], strides = [1, 1]} : vector<32x384xbf16> to vector<16x8xbf16>
    %153 = vector.extract_strided_slice %15 {offsets = [16, 272], sizes = [16, 8], strides = [1, 1]} : vector<32x384xbf16> to vector<16x8xbf16>
    %cst_53 = arith.constant dense<0.000000e+00> : vector<16x16xf32>
    %154 = tpu.matmul %151, %152, %cst_53 {dimension_numbers = #tpu.dot_dimension_numbers<[1], [1], [0], [0], [0, 0, 1, 0], [], []>} : vector<16x8xbf16>, vector<16x8xbf16>, vector<16x16xf32> -> vector<16x16xf32>
    %cst_54 = arith.constant 0.353553385 : f32
    %155 = vector.broadcast %cst_54 : f32 to vector<16x16xf32>
    %156 = arith.mulf %154, %155 : vector<16x16xf32>
    %cst_55 = arith.constant 0xFF800000 : f32
    %157 = vector.broadcast %cst_55 : f32 to vector<16x16xf32>
    %158 = arith.select %18, %156, %157 : vector<16x16xi1>, vector<16x16xf32>
    %cst_56 = arith.constant dense<0xFF800000> : vector<16xf32>
    %159 = vector.multi_reduction <maximumf>, %158, %cst_56 [1] : vector<16x16xf32> to vector<16xf32>
    %160 = vector.shape_cast %159 : vector<16xf32> to vector<16x1xf32>
    %161 = vector.broadcast %160 : vector<16x1xf32> to vector<16x16xf32>
    %162 = arith.subf %158, %161 : vector<16x16xf32>
    %163 = math.exp %162 : vector<16x16xf32>
    %cst_57 = arith.constant dense<0.000000e+00> : vector<16xf32>
    %164 = vector.multi_reduction <add>, %163, %cst_57 [1] : vector<16x16xf32> to vector<16xf32>
    %165 = vector.shape_cast %164 : vector<16xf32> to vector<16x1xf32>
    %166 = tpu.reciprocal %165 {approx = true} : vector<16x1xf32> -> vector<16x1xf32>
    %167 = vector.broadcast %166 : vector<16x1xf32> to vector<16x16xf32>
    %168 = arith.mulf %163, %167 : vector<16x16xf32>
    %169 = arith.truncf %168 : vector<16x16xf32> to vector<16x16xbf16>
    %cst_58 = arith.constant dense<0.000000e+00> : vector<16x8xf32>
    %170 = tpu.matmul %169, %153, %cst_58 {dimension_numbers = #tpu.dot_dimension_numbers<[1], [0], [0], [1], [0, 0, 1, 1], [], []>} : vector<16x16xbf16>, vector<16x8xbf16>, vector<16x8xf32> -> vector<16x8xf32>
    %171 = arith.truncf %170 : vector<16x8xf32> to vector<16x8xbf16>
    %c16_59 = arith.constant 16 : index
    %c16_60 = arith.constant 16 : index
    %172 = vector.load %arg16[%c16_59, %c16_60] : memref<32x128xbf16, #tpu.memory_space<vmem>>, vector<16x8xbf16>
    tpu.vector_store %arg16[%c16_59, %c16_60], %171 {strides = array<i32>} : memref<32x128xbf16, #tpu.memory_space<vmem>>, vector<16x8xbf16>,
    %173 = vector.extract_strided_slice %15 {offsets = [16, 24], sizes = [16, 8], strides = [1, 1]} : vector<32x384xbf16> to vector<16x8xbf16>
    %174 = vector.extract_strided_slice %15 {offsets = [16, 152], sizes = [16, 8], strides = [1, 1]} : vector<32x384xbf16> to vector<16x8xbf16>
    %175 = vector.extract_strided_slice %15 {offsets = [16, 280], sizes = [16, 8], strides = [1, 1]} : vector<32x384xbf16> to vector<16x8xbf16>
    %cst_61 = arith.constant dense<0.000000e+00> : vector<16x16xf32>
    %176 = tpu.matmul %173, %174, %cst_61 {dimension_numbers = #tpu.dot_dimension_numbers<[1], [1], [0], [0], [0, 0, 1, 0], [], []>} : vector<16x8xbf16>, vector<16x8xbf16>, vector<16x16xf32> -> vector<16x16xf32>
    %cst_62 = arith.constant 0.353553385 : f32
    %177 = vector.broadcast %cst_62 : f32 to vector<16x16xf32>
    %178 = arith.mulf %176, %177 : vector<16x16xf32>
    %cst_63 = arith.constant 0xFF800000 : f32
    %179 = vector.broadcast %cst_63 : f32 to vector<16x16xf32>
    %180 = arith.select %18, %178, %179 : vector<16x16xi1>, vector<16x16xf32>
    %cst_64 = arith.constant dense<0xFF800000> : vector<16xf32>
    %181 = vector.multi_reduction <maximumf>, %180, %cst_64 [1] : vector<16x16xf32> to vector<16xf32>
    %182 = vector.shape_cast %181 : vector<16xf32> to vector<16x1xf32>
    %183 = vector.broadcast %182 : vector<16x1xf32> to vector<16x16xf32>
    %184 = arith.subf %180, %183 : vector<16x16xf32>
    %185 = math.exp %184 : vector<16x16xf32>
    %cst_65 = arith.constant dense<0.000000e+00> : vector<16xf32>
    %186 = vector.multi_reduction <add>, %185, %cst_65 [1] : vector<16x16xf32> to vector<16xf32>
    %187 = vector.shape_cast %186 : vector<16xf32> to vector<16x1xf32>
    %188 = tpu.reciprocal %187 {approx = true} : vector<16x1xf32> -> vector<16x1xf32>
    %189 = vector.broadcast %188 : vector<16x1xf32> to vector<16x16xf32>
    %190 = arith.mulf %185, %189 : vector<16x16xf32>
    %191 = arith.truncf %190 : vector<16x16xf32> to vector<16x16xbf16>
    %cst_66 = arith.constant dense<0.000000e+00> : vector<16x8xf32>
    %192 = tpu.matmul %191, %175, %cst_66 {dimension_numbers = #tpu.dot_dimension_numbers<[1], [0], [0], [1], [0, 0, 1, 1], [], []>} : vector<16x16xbf16>, vector<16x8xbf16>, vector<16x8xf32> -> vector<16x8xf32>
    %193 = arith.truncf %192 : vector<16x8xf32> to vector<16x8xbf16>
    %c16_67 = arith.constant 16 : index
    %c24_68 = arith.constant 24 : index
    %194 = vector.load %arg16[%c16_67, %c24_68] : memref<32x128xbf16, #tpu.memory_space<vmem>>, vector<16x8xbf16>
    tpu.vector_store %arg16[%c16_67, %c24_68], %193 {strides = array<i32>} : memref<32x128xbf16, #tpu.memory_space<vmem>>, vector<16x8xbf16>,
    %c0_69 = arith.constant 0 : index
    %c0_70 = arith.constant 0 : index
    %195 = vector.load %arg16[%c0_69, %c0_70] : memref<32x128xbf16, #tpu.memory_space<vmem>>, vector<32x128xbf16>
    %c0_71 = arith.constant 0 : index
    %c0_72 = arith.constant 0 : index
    %c0_73 = arith.constant 0 : index
    %196 = vector.load %arg4[%c0_71, %c0_72, %c0_73] : memref<1x128x128xbf16, #tpu.memory_space<vmem>>, vector<1x128x128xbf16>
    %197 = vector.shape_cast %196 : vector<1x128x128xbf16> to vector<128x128xbf16>
    %cst_74 = arith.constant dense<0.000000e+00> : vector<32x128xf32>
    %198 = tpu.matmul %195, %197, %cst_74 {dimension_numbers = #tpu.dot_dimension_numbers<[1], [0], [0], [1], [0, 0, 1, 1], [], []>} : vector<32x128xbf16>, vector<128x128xbf16>, vector<32x128xf32> -> vector<32x128xf32>
    %c0_75 = arith.constant 0 : index
    %c0_76 = arith.constant 0 : index
    %c0_77 = arith.constant 0 : index
    %199 = vector.load %arg5[%c0_75, %c0_76, %c0_77] : memref<1x1x128xf32, #tpu.memory_space<vmem>>, vector<1x1x128xf32>
    %200 = vector.shape_cast %199 : vector<1x1x128xf32> to vector<1x128xf32>
    %201 = vector.broadcast %200 : vector<1x128xf32> to vector<32x128xf32>
    %202 = arith.addf %198, %201 : vector<32x128xf32>
    %203 = arith.addf %3, %202 : vector<32x128xf32>
    %c0_78 = arith.constant 0 : index
    %c0_79 = arith.constant 0 : index
    %c0_80 = arith.constant 0 : index
    %204 = vector.load %arg6[%c0_78, %c0_79, %c0_80] : memref<1x1x128xf32, #tpu.memory_space<vmem>>, vector<1x1x128xf32>
    %205 = vector.shape_cast %204 : vector<1x1x128xf32> to vector<1x128xf32>
    %c0_81 = arith.constant 0 : index
    %c0_82 = arith.constant 0 : index
    %c0_83 = arith.constant 0 : index
    %206 = vector.load %arg7[%c0_81, %c0_82, %c0_83] : memref<1x1x128xf32, #tpu.memory_space<vmem>>, vector<1x1x128xf32>
    %207 = vector.shape_cast %206 : vector<1x1x128xf32> to vector<1x128xf32>
    %cst_84 = arith.constant 0.000000e+00 : f32
    %208 = vector.shape_cast %6 : vector<1x128xi1> to vector<1x128xi1>
    %209 = vector.broadcast %208 : vector<1x128xi1> to vector<32x128xi1>
    %210 = vector.broadcast %cst_84 : f32 to vector<32x128xf32>
    %211 = arith.select %209, %203, %210 : vector<32x128xi1>, vector<32x128xf32>
    %cst_85 = arith.constant dense<0.000000e+00> : vector<32xf32>
    %212 = vector.multi_reduction <add>, %211, %cst_85 [1] : vector<32x128xf32> to vector<32xf32>
    %213 = vector.shape_cast %212 : vector<32xf32> to vector<32x1xf32>
    %cst_86 = arith.constant 3.200000e+01 : f32
    %214 = vector.broadcast %cst_86 : f32 to vector<32x1xf32>
    %215 = arith.divf %213, %214 : vector<32x1xf32>
    %216 = vector.broadcast %215 : vector<32x1xf32> to vector<32x128xf32>
    %217 = arith.subf %203, %216 : vector<32x128xf32>
    %cst_87 = arith.constant 0.000000e+00 : f32
    %218 = vector.shape_cast %6 : vector<1x128xi1> to vector<1x128xi1>
    %219 = vector.broadcast %218 : vector<1x128xi1> to vector<32x128xi1>
    %220 = vector.broadcast %cst_87 : f32 to vector<32x128xf32>
    %221 = arith.select %219, %217, %220 : vector<32x128xi1>, vector<32x128xf32>
    %222 = arith.mulf %221, %221 : vector<32x128xf32>
    %cst_88 = arith.constant dense<0.000000e+00> : vector<32xf32>
    %223 = vector.multi_reduction <add>, %222, %cst_88 [1] : vector<32x128xf32> to vector<32xf32>
    %224 = vector.shape_cast %223 : vector<32xf32> to vector<32x1xf32>
    %cst_89 = arith.constant 3.200000e+01 : f32
    %225 = vector.broadcast %cst_89 : f32 to vector<32x1xf32>
    %226 = arith.divf %224, %225 : vector<32x1xf32>
    %cst_90 = arith.constant 9.99999974E-6 : f32
    %227 = vector.broadcast %cst_90 : f32 to vector<32x1xf32>
    %228 = arith.addf %226, %227 : vector<32x1xf32>
    %229 = math.rsqrt %228 : vector<32x1xf32>
    %230 = vector.broadcast %229 : vector<32x1xf32> to vector<32x128xf32>
    %231 = arith.mulf %221, %230 : vector<32x128xf32>
    %232 = vector.broadcast %205 : vector<1x128xf32> to vector<32x128xf32>
    %233 = arith.mulf %231, %232 : vector<32x128xf32>
    %234 = vector.broadcast %207 : vector<1x128xf32> to vector<32x128xf32>
    %235 = arith.addf %233, %234 : vector<32x128xf32>
    %236 = arith.truncf %235 : vector<32x128xf32> to vector<32x128xbf16>
    %c0_91 = arith.constant 0 : index
    %c0_92 = arith.constant 0 : index
    %c0_93 = arith.constant 0 : index
    %237 = vector.load %arg8[%c0_91, %c0_92, %c0_93] : memref<1x128x128xbf16, #tpu.memory_space<vmem>>, vector<1x128x128xbf16>
    %238 = vector.shape_cast %237 : vector<1x128x128xbf16> to vector<128x128xbf16>
    %cst_94 = arith.constant dense<0.000000e+00> : vector<32x128xf32>
    %239 = tpu.matmul %236, %238, %cst_94 {dimension_numbers = #tpu.dot_dimension_numbers<[1], [0], [0], [1], [0, 0, 1, 1], [], []>} : vector<32x128xbf16>, vector<128x128xbf16>, vector<32x128xf32> -> vector<32x128xf32>
    %c0_95 = arith.constant 0 : index
    %c0_96 = arith.constant 0 : index
    %c0_97 = arith.constant 0 : index
    %240 = vector.load %arg9[%c0_95, %c0_96, %c0_97] : memref<1x1x128xf32, #tpu.memory_space<vmem>>, vector<1x1x128xf32>
    %241 = vector.shape_cast %240 : vector<1x1x128xf32> to vector<1x128xf32>
    %242 = vector.broadcast %241 : vector<1x128xf32> to vector<32x128xf32>
    %243 = arith.addf %239, %242 : vector<32x128xf32>
    %cst_98 = arith.constant 0.000000e+00 : f32
    %244 = vector.broadcast %cst_98 : f32 to vector<32x128xf32>
    %245 = arith.maximumf %243, %244 : vector<32x128xf32>
    %246 = arith.truncf %245 : vector<32x128xf32> to vector<32x128xbf16>
    %c0_99 = arith.constant 0 : index
    %c0_100 = arith.constant 0 : index
    %c0_101 = arith.constant 0 : index
    %247 = vector.load %arg10[%c0_99, %c0_100, %c0_101] : memref<1x128x128xbf16, #tpu.memory_space<vmem>>, vector<1x128x128xbf16>
    %248 = vector.shape_cast %247 : vector<1x128x128xbf16> to vector<128x128xbf16>
    %cst_102 = arith.constant dense<0.000000e+00> : vector<32x128xf32>
    %249 = tpu.matmul %246, %248, %cst_102 {dimension_numbers = #tpu.dot_dimension_numbers<[1], [0], [0], [1], [0, 0, 1, 1], [], []>} : vector<32x128xbf16>, vector<128x128xbf16>, vector<32x128xf32> -> vector<32x128xf32>
    %c0_103 = arith.constant 0 : index
    %c0_104 = arith.constant 0 : index
    %c0_105 = arith.constant 0 : index
    %250 = vector.load %arg11[%c0_103, %c0_104, %c0_105] : memref<1x1x128xf32, #tpu.memory_space<vmem>>, vector<1x1x128xf32>
    %251 = vector.shape_cast %250 : vector<1x1x128xf32> to vector<1x128xf32>
    %252 = vector.broadcast %251 : vector<1x128xf32> to vector<32x128xf32>
    %253 = arith.addf %249, %252 : vector<32x128xf32>
    %254 = arith.addf %235, %253 : vector<32x128xf32>
    %c0_106 = arith.constant 0 : index
    %c0_107 = arith.constant 0 : index
    %c0_108 = arith.constant 0 : index
    %255 = vector.load %arg12[%c0_106, %c0_107, %c0_108] : memref<1x1x128xf32, #tpu.memory_space<vmem>>, vector<1x1x128xf32>
    %256 = vector.shape_cast %255 : vector<1x1x128xf32> to vector<1x128xf32>
    %c0_109 = arith.constant 0 : index
    %c0_110 = arith.constant 0 : index
    %c0_111 = arith.constant 0 : index
    %257 = vector.load %arg13[%c0_109, %c0_110, %c0_111] : memref<1x1x128xf32, #tpu.memory_space<vmem>>, vector<1x1x128xf32>
    %258 = vector.shape_cast %257 : vector<1x1x128xf32> to vector<1x128xf32>
    %cst_112 = arith.constant 0.000000e+00 : f32
    %259 = vector.shape_cast %6 : vector<1x128xi1> to vector<1x128xi1>
    %260 = vector.broadcast %259 : vector<1x128xi1> to vector<32x128xi1>
    %261 = vector.broadcast %cst_112 : f32 to vector<32x128xf32>
    %262 = arith.select %260, %254, %261 : vector<32x128xi1>, vector<32x128xf32>
    %cst_113 = arith.constant dense<0.000000e+00> : vector<32xf32>
    %263 = vector.multi_reduction <add>, %262, %cst_113 [1] : vector<32x128xf32> to vector<32xf32>
    %264 = vector.shape_cast %263 : vector<32xf32> to vector<32x1xf32>
    %cst_114 = arith.constant 3.200000e+01 : f32
    %265 = vector.broadcast %cst_114 : f32 to vector<32x1xf32>
    %266 = arith.divf %264, %265 : vector<32x1xf32>
    %267 = vector.broadcast %266 : vector<32x1xf32> to vector<32x128xf32>
    %268 = arith.subf %254, %267 : vector<32x128xf32>
    %cst_115 = arith.constant 0.000000e+00 : f32
    %269 = vector.shape_cast %6 : vector<1x128xi1> to vector<1x128xi1>
    %270 = vector.broadcast %269 : vector<1x128xi1> to vector<32x128xi1>
    %271 = vector.broadcast %cst_115 : f32 to vector<32x128xf32>
    %272 = arith.select %270, %268, %271 : vector<32x128xi1>, vector<32x128xf32>
    %273 = arith.mulf %272, %272 : vector<32x128xf32>
    %cst_116 = arith.constant dense<0.000000e+00> : vector<32xf32>
    %274 = vector.multi_reduction <add>, %273, %cst_116 [1] : vector<32x128xf32> to vector<32xf32>
    %275 = vector.shape_cast %274 : vector<32xf32> to vector<32x1xf32>
    %cst_117 = arith.constant 3.200000e+01 : f32
    %276 = vector.broadcast %cst_117 : f32 to vector<32x1xf32>
    %277 = arith.divf %275, %276 : vector<32x1xf32>
    %cst_118 = arith.constant 9.99999974E-6 : f32
    %278 = vector.broadcast %cst_118 : f32 to vector<32x1xf32>
    %279 = arith.addf %277, %278 : vector<32x1xf32>
    %280 = math.rsqrt %279 : vector<32x1xf32>
    %281 = vector.broadcast %280 : vector<32x1xf32> to vector<32x128xf32>
    %282 = arith.mulf %272, %281 : vector<32x128xf32>
    %283 = vector.broadcast %256 : vector<1x128xf32> to vector<32x128xf32>
    %284 = arith.mulf %282, %283 : vector<32x128xf32>
    %285 = vector.broadcast %258 : vector<1x128xf32> to vector<32x128xf32>
    %286 = arith.addf %284, %285 : vector<32x128xf32>
    %c0_119 = arith.constant 0 : index
    %c0_120 = arith.constant 0 : index
    %287 = vector.load %arg15[%c0_119, %c0_120] : memref<32x128xf32, #tpu.memory_space<vmem>>, vector<32x128xf32>
    tpu.vector_store %arg15[%c0_119, %c0_120], %286 {strides = array<i32>} : memref<32x128xf32, #tpu.memory_space<vmem>>, vector<32x128xf32>,
    %c1_i32 = arith.constant 1 : i32
    %288 = arith.cmpi eq, %arg0, %c1_i32 : i32
    %289 = arith.extui %288 : i1 to i32
    %c0_i32_121 = arith.constant 0 : i32
    %290 = arith.cmpi ne, %289, %c0_i32_121 : i32
    scf.if %290 {
      %291 = arith.truncf %286 : vector<32x128xf32> to vector<32x128xbf16>
      %c0_122 = arith.constant 0 : index
      %c0_123 = arith.constant 0 : index
      %292 = vector.load %arg14[%c0_122, %c0_123] : memref<32x128xbf16, #tpu.memory_space<vmem>>, vector<32x128xbf16>
      tpu.vector_store %arg14[%c0_122, %c0_123], %291 {strides = array<i32>} : memref<32x128xbf16, #tpu.memory_space<vmem>>, vector<32x128xbf16>,
    } else {
    }
    return
  }
  func.func @transform_0(%arg0: i32) -> (i32, i32) {
    %c0_i32 = arith.constant 0 : i32
    %c0_i32_0 = arith.constant 0 : i32
    %c0_i32_1 = arith.constant 0 : i32
    return %c0_i32, %c0_i32_0 : i32, i32
  }
  func.func @transform_1(%arg0: i32) -> (i32, i32, i32) {
    %c0_i32 = arith.constant 0 : i32
    %c0_i32_0 = arith.constant 0 : i32
    %c0_i32_1 = arith.constant 0 : i32
    return %arg0, %c0_i32, %c0_i32_0 : i32, i32, i32
  }
  func.func @transform_2(%arg0: i32) -> (i32, i32, i32) {
    %c0_i32 = arith.constant 0 : i32
    %c0_i32_0 = arith.constant 0 : i32
    %c0_i32_1 = arith.constant 0 : i32
    return %arg0, %c0_i32, %c0_i32_0 : i32, i32, i32
  }
  func.func @transform_3(%arg0: i32) -> (i32, i32, i32) {
    %c0_i32 = arith.constant 0 : i32
    %c0_i32_0 = arith.constant 0 : i32
    %c0_i32_1 = arith.constant 0 : i32
    return %arg0, %c0_i32, %c0_i32_0 : i32, i32, i32
  }
  func.func @transform_4(%arg0: i32) -> (i32, i32, i32) {
    %c0_i32 = arith.constant 0 : i32
    %c0_i32_0 = arith.constant 0 : i32
    %c0_i32_1 = arith.constant 0 : i32
    return %arg0, %c0_i32, %c0_i32_0 : i32, i32, i32
  }
  func.func @transform_5(%arg0: i32) -> (i32, i32, i32) {
    %c0_i32 = arith.constant 0 : i32
    %c0_i32_0 = arith.constant 0 : i32
    %c0_i32_1 = arith.constant 0 : i32
    return %arg0, %c0_i32, %c0_i32_0 : i32, i32, i32
  }
  func.func @transform_6(%arg0: i32) -> (i32, i32, i32) {
    %c0_i32 = arith.constant 0 : i32
    %c0_i32_0 = arith.constant 0 : i32
    %c0_i32_1 = arith.constant 0 : i32
    return %arg0, %c0_i32, %c0_i32_0 : i32, i32, i32
  }
  func.func @transform_7(%arg0: i32) -> (i32, i32, i32) {
    %c0_i32 = arith.constant 0 : i32
    %c0_i32_0 = arith.constant 0 : i32
    %c0_i32_1 = arith.constant 0 : i32
    return %arg0, %c0_i32, %c0_i32_0 : i32, i32, i32
  }
  func.func @transform_8(%arg0: i32) -> (i32, i32, i32) {
    %c0_i32 = arith.constant 0 : i32
    %c0_i32_0 = arith.constant 0 : i32
    %c0_i32_1 = arith.constant 0 : i32
    return %arg0, %c0_i32, %c0_i32_0 : i32, i32, i32
  }
  func.func @transform_9(%arg0: i32) -> (i32, i32, i32) {
    %c0_i32 = arith.constant 0 : i32
    %c0_i32_0 = arith.constant 0 : i32
    %c0_i32_1 = arith.constant 0 : i32
    return %arg0, %c0_i32, %c0_i32_0 : i32, i32, i32
  }
  func.func @transform_10(%arg0: i32) -> (i32, i32, i32) {
    %c0_i32 = arith.constant 0 : i32
    %c0_i32_0 = arith.constant 0 : i32
    %c0_i32_1 = arith.constant 0 : i32
    return %arg0, %c0_i32, %c0_i32_0 : i32, i32, i32
  }
  func.func @transform_11(%arg0: i32) -> (i32, i32, i32) {
    %c0_i32 = arith.constant 0 : i32
    %c0_i32_0 = arith.constant 0 : i32
    %c0_i32_1 = arith.constant 0 : i32
    return %arg0, %c0_i32, %c0_i32_0 : i32, i32, i32
  }
  func.func @transform_12(%arg0: i32) -> (i32, i32, i32) {
    %c0_i32 = arith.constant 0 : i32
    %c0_i32_0 = arith.constant 0 : i32
    %c0_i32_1 = arith.constant 0 : i32
    return %arg0, %c0_i32, %c0_i32_0 : i32, i32, i32
  }
  func.func @transform_13(%arg0: i32) -> (i32, i32) {
    %c0_i32 = arith.constant 0 : i32
    %c0_i32_0 = arith.constant 0 : i32
    %c0_i32_1 = arith.constant 0 : i32
    return %c0_i32, %c0_i32_0 : i32, i32
  }
}

</mosaic_0001>

<bundles_post_ra>
// kernel: tpu_custom_call.1
= control target key start
LH: loop header
LB: loop body
LE: loop exit
PB: predicated region body
PF: predicated region fallthrough
CT: control target
= control target key end

     0   :  { %s4528_s0 = inlined_call_operand.hbm [shape: f32[32,128], index: 0, kind: input, shape index: {}]   ;;  %s4529_s1 = inlined_call_operand.hbm [shape: bf16[2,128,384], index: 1, kind: input, shape index: {}]   ;;  %s4530_s2 = inlined_call_operand.vmem [shape: f32[2,1,384], index: 2, kind: input, shape index: {}]   ;;  %s4531_s3 = inlined_call_operand.hbm [shape: bf16[2,128,128], index: 3, kind: input, shape index: {}]   ;;  %s4532_s4 = inlined_call_operand.vmem [shape: f32[2,1,128], index: 4, kind: input, shape index: {}]   ;;  %s4533_s5 = inlined_call_operand.vmem [shape: f32[2,1,128], index: 5, kind: input, shape index: {}]   ;;  %s4534_s6 = inlined_call_operand.vmem [shape: f32[2,1,128], index: 6, kind: input, shape index: {}]   ;;  %s4535_s7 = inlined_call_operand.hbm [shape: bf16[2,128,128], index: 7, kind: input, shape index: {}]   ;;  %s4536_s8 = inlined_call_operand.vmem [shape: f32[2,1,128], index: 8, kind: input, shape index: {}]   ;;  %s4537_s9 = inlined_call_operand.hbm [shape: bf16[2,128,128], index: 9, kind: input, shape index: {}]   ;;  %s4538_s10 = inlined_call_operand.vmem [shape: f32[2,1,128], index: 10, kind: input, shape index: {}]   ;;  %s4539_s11 = inlined_call_operand.vmem [shape: f32[2,1,128], index: 11, kind: input, shape index: {}]   ;;  %s4540_s12 = inlined_call_operand.vmem [shape: f32[2,1,128], index: 12, kind: input, shape index: {}]   ;;  %s4541_s13 = inlined_call_operand.hbm [shape: bf16[32,128], index: 13, kind: output, shape index: {}]  }
   0x1   :  { %4560 = sst [smem:[#allocation22_spill]] %s4528_s0 }
   0x2   :  { %4561 = sst [smem:[#allocation23_spill]] %s4529_s1 }
   0x3   :  { %4562 = sst [smem:[#allocation24_spill]] %s4531_s3 }
   0x4   :  { %4563 = sst [smem:[#allocation25_spill]] %s4535_s7 }
   0x5   :  { %4564 = sst [smem:[#allocation26_spill]] %s4536_s8 }
   0x6   :  { %4565 = sst [smem:[#allocation27_spill]] %s4537_s9 }
   0x7   :  { %4566 = sst [smem:[#allocation28_spill]] %s4538_s10 }
   0x8   :  { %4567 = sst [smem:[#allocation29_spill]] %s4539_s11 }
   0x9   :  { %4568 = sst [smem:[#allocation30_spill]] %s4540_s12 }
   0xa   :  { %4569 = sst [smem:[#allocation31_spill]] %s4541_s13 }
   0xb   :  { %18 = vsyncpa [#allocation5], 0 }
   0xc   :  { %19 = vsyncpa [#allocation8], 0 }
   0xd   :  { %21 = vsyncpa [#allocation8 + $0x1], 0 }
   0xe   :  { %22 = vsyncpa [#allocation11], 0 }
   0xf   :  { %24 = vsyncpa [#allocation11 + $0x1], 0 }
  0x10   :  { %25 = vsyncpa [#allocation6], 0  ;;  %s3724_s25 = smov 0   ;;  %s3726_s26 = smov 0  }
  0x11   :  { %s3728_s27 = smov 0   ;;  %s3730_s28 = smov 0  }
  0x12 LB: > { %4570 = sst [smem:[#allocation18_spill]] %s3620_s26  ;;  %s3745_s29 = sadd.s32 1, %s3628_s28   ;;  %s3628_s28 = sphi %s3730_s28, %s4611_s28   ;;  %s3624_s27 = sphi %s3728_s27, %s4614_s27   ;;  %s3620_s26 = sphi %s3726_s26, %s4613_s26   ;;  %s3616_s25 = sphi %s3724_s25, %s4612_s25  }
  0x13   : > { %4571 = sst [smem:[#allocation19_spill]] %s3624_s27  ;;  %s59_s30 = sadd.s32 1, %s3624_s27 }
  0x14   : > { %4572 = sst [smem:[#allocation20_spill]] %s3745_s29  ;;  %s56_s14 = ssub.s32 %s3628_s28, %s3745_s29 }
  0x15   : > { %p66_p0 = scmp.ne.s32.totalorder %s3624_s27, %s3620_s26  ;;  %p57_p1 = scmp.eq.s32.totalorder %s56_s14, 0 }
  0x16   : > { %p67_p2 = scmp.eq.s32.totalorder %s3628_s28, 0  ;;  %p3212_p3 = scmp.lt.s32.totalorder %s3628_s28, 2 }
  0x17   : > { %s3755_s15 = scalar_select %p57_p1, %s3624_s27, %s59_s30  }
  0x18   : > { %p68_p4 = por %p67_p2, %p66_p0  ;;  %s4543_s16 = sand.u32 1, %s3628_s28  }
  0x19   : > { %4573 = sst [smem:[#allocation21_spill]] %s3755_s15  ;;  %s4542_s17 = sand.u32 1, %s3624_s27  }
  0x1a   : > { %s3174_s18 = smul.u32 192, %s4542_s17  ;;  %p3761_p5 = pnand %p3212_p3, %p68_p4 }
  0x1b   : > { %s3175_s20 = smul.u32 3072, %s3628_s28  ;;  %s4575_s1 = sld [smem:[#allocation23_spill]] }
  0x1c   : > { %s4574_s19 = scalar_select %p3761_p5, 1, 0 }
  0x1d   : > { %s420_s24 = scalar_lea.vmem [#allocation7], %s3174_s18  ;;  %s3775_s14 = scalar_lea.sflag [#allocation8], %s4543_s16 }
  0x1e   : > { %s427_s30 = sshll.u32 %s420_s24, 4  ;;  %p3781_p7 = pneg %p3761_p5  ;;  %s3771_s30 = int_to_ptr.vmem [resolvable:$true] %s427_s30 }
  0x20   : > { %s4576_s15 = scalar_select %p3781_p7, 1, 0 }
  0x21   : > { %s3769_s23 = scalar_lea.hbm %s4575_s1, %s3175_s20  ;;  %s3413_s18 = scalar_lea.hbm %s4575_s1, 6144 }
  0x22   : > { %s3408_s17 = scalar_lea.hbm %s3769_s23, 3072  ;;  %p3414_p10 = scmp.lt.u32.totalorder %s3769_s23, %s4575_s1 }
  0x23   : > { %p3409_p6 = scmp.ne.s32.totalorder %s3769_s23, %s3408_s17  ;;  %p3415_p11 = scmp.lt.u32.totalorder %s3413_s18, %s3408_s17 }
  0x24   : > { %p3417_p13 = scmp.lt.u32.totalorder %s3408_s17, %s3769_s23 }
  0x25   : > { %p3411_p8 = pnand %p3781_p7, %p3409_p6  ;;  %p3416_p12 = por %p3415_p11, %p3414_p10 }
  0x27   : > { %p3412_p9 = pneg %p3411_p8  ;;  %p3418_p0 = por %p3417_p13, %p3416_p12 }
  0x29   : > { %p3419_p1 = pnand %p3418_p0, %p3412_p9 }
  0x2b   : > { %3422 = shalt.err (!%p3419_p1)
}
  0x2c   : > { %s3423_s16 = scalar_lea.vmem %s3771_s30, 3072  ;;  %s3630_s20 = smov [#allocation7]  }
  0x2d   : > { %p3424_p2 = scmp.ne.s32.totalorder %s3771_s30, %s3423_s16  ;;  %s3428_s21 = sshll.u32 %s3630_s20, 4  ;;  %s3429_s21 = int_to_ptr.vmem [resolvable:$false] %s3428_s21 }
  0x2e   : > { %s3430_s22 = scalar_lea.vmem %s3429_s21, 6144  ;;  %p3431_p6 = scmp.lt.s32.totalorder %s3771_s30, %s3429_s21 }
  0x2f   : > { %p3426_p3 = pnand %p3424_p2, %p3781_p7  ;;  %p3432_p8 = scmp.lt.s32.totalorder %s3430_s22, %s3423_s16 }
  0x31   : > { %p3427_p4 = pneg %p3426_p3  ;;  %p3433_p10 = por %p3432_p8, %p3431_p6 }
  0x33   : > { %p3434_p11 = pnand %p3433_p10, %p3427_p4 }
  0x35   : > { %3437 = shalt.err (!%p3434_p11)
}
  0x36   : > { %s3631_s17 = smov 192   ;;  %s3632_s18 = smov 12  }
  0x37   : > { %3201 = dma.hbm_to_vmem [thread:$0]  (!%p3761_p5), %s3769_s23, 3072, %s3771_s30, %s3775_s14, %s3631_s17, %s3631_s17, %s3632_s18  }
  0x38   : > { %s4577_s24 = sand.u32 1, %s3624_s27   ;;  %s3810_s16 = sshll.u32 %s3628_s28, 10 }
  0x39   : > { %s3807_s20 = sshll.u32 %s4577_s24, 6  ;;  %s4578_s7 = sld [smem:[#allocation25_spill]] }
  0x3a   : > { %s487_s29 = scalar_lea.vmem [#allocation10], %s3807_s20  ;;  %s4579_s23 = sand.u32 1, %s3628_s28  }
  0x3b   : > { %s494_s13 = sshll.u32 %s487_s29, 4  ;;  %s3823_s30 = scalar_lea.sflag [#allocation11], %s4579_s23  ;;  %s3819_s13 = int_to_ptr.vmem [resolvable:$true] %s494_s13 }
  0x3f   : > { %s3816_s1 = scalar_lea.hbm %s4578_s7, %s3810_s16  ;;  %s3443_s21 = scalar_lea.hbm %s4578_s7, 2048 }
  0x40   : > { %s3438_s17 = scalar_lea.hbm %s3816_s1, 1024  ;;  %p3444_p0 = scmp.lt.u32.totalorder %s3816_s1, %s4578_s7 }
  0x41   : > { %p3439_p9 = scmp.ne.s32.totalorder %s3816_s1, %s3438_s17  ;;  %p3445_p1 = scmp.lt.u32.totalorder %s3443_s21, %s3438_s17 }
  0x42   : > { %p3447_p3 = scmp.lt.u32.totalorder %s3438_s17, %s3816_s1 }
  0x43   : > { %p3441_p12 = pnand %p3439_p9, %p3781_p7  ;;  %p3446_p2 = por %p3445_p1, %p3444_p0 }
  0x45   : > { %p3442_p13 = pneg %p3441_p12  ;;  %p3448_p4 = por %p3447_p3, %p3446_p2 }
  0x47   : > { %p3449_p6 = pnand %p3448_p4, %p3442_p13 }
  0x49   : > { %3452 = shalt.err (!%p3449_p6)
}
  0x4a   : > { %s3453_s29 = scalar_lea.vmem %s3819_s13, 1024  ;;  %s3633_s23 = smov [#allocation10]  }
  0x4b   : > { %p3454_p8 = scmp.ne.s32.totalorder %s3819_s13, %s3453_s29  ;;  %s3458_s18 = sshll.u32 %s3633_s23, 4  ;;  %s3459_s18 = int_to_ptr.vmem [resolvable:$false] %s3458_s18 }
  0x4c   : > { %s3460_s27 = scalar_lea.vmem %s3459_s18, 2048  ;;  %p3461_p9 = scmp.lt.s32.totalorder %s3819_s13, %s3459_s18 }
  0x4d   : > { %p3456_p10 = pnand %p3454_p8, %p3781_p7  ;;  %p3462_p12 = scmp.lt.s32.totalorder %s3460_s27, %s3453_s29 }
  0x4f   : > { %p3457_p11 = pneg %p3456_p10  ;;  %p3463_p0 = por %p3462_p12, %p3461_p9 }
  0x51   : > { %p3464_p1 = pnand %p3463_p0, %p3457_p11 }
  0x53   : > { %3467 = shalt.err (!%p3464_p1)
}
  0x54   : > { %s4548_s17 = smov 64   ;;  %s4550_s24 = smov 4  }
  0x55   : > { %3207 = dma.hbm_to_vmem [thread:$0]  (!%p3761_p5), %s3816_s1, 1024, %s3819_s13, %s3823_s30, %s4548_s17, %s4548_s17, %s4550_s24  }
  0x56   : > { %s3851_s21 = sadd.s32 4294967295, %s3628_s28   ;;  %p72_p13 = scmp.ne.s32.totalorder %s3620_s26, %s3616_s25 }
  0x57   : > { %p4552_p2 = scmp.eq.s32.totalorder %s3851_s21, 0  ;;  %p2809_p3 = scmp.ge.s32.totalorder %s3628_s28, 1 }
  0x58   : > { %p390_p4 = scmp.lt.s32.totalorder %s3628_s28, 3  ;;  %s3636_s1 = smov [#allocation4]  }
  0x59   : > { %p3860_p6 = por %p4552_p2, %p72_p13  ;;  %s402_s13 = sshll.u32 %s3636_s1, 4  ;;  %s403_s13 = int_to_ptr.vmem [resolvable:$true] %s402_s13 }
  0x5a   : > { %p3865_p10 = pnand %p2809_p3, %p390_p4  ;;  %s4583_s3 = sld [smem:[#allocation24_spill]] }
  0x5b   : > { %s4580_s22 = scalar_select %p3860_p6, 1, 0 }
  0x5c   : > { %s4581_s29 = scalar_select %p3865_p10, 1, 0 }
  0x5d   : > { %p3194_p11 = pneg %p3865_p10  ;;  %s448_s27 = scalar_lea.vmem [#allocation9], %s3807_s20 }
  0x5e   : > { %s455_s17 = sshll.u32 %s448_s27, 4  ;;  %s4584_s0 = sld [smem:[#allocation22_spill]]  ;;  %s3884_s17 = int_to_ptr.vmem [resolvable:$true] %s455_s17 }
  0x5f   : > { %p3873_p9 = pnand %p3194_p11, %p4552_p2 }
  0x60   : > { %s3881_s18 = scalar_lea.hbm %s4583_s3, %s3810_s16 }
  0x61   : > { %p3470_p0 = pneg %p3873_p9 }
  0x64   : > { %s3468_s7 = scalar_lea.hbm %s4584_s0, 512 }
  0x65   : > { %p3469_p12 = scmp.ne.s32.totalorder %s4584_s0, %s3468_s7  ;;  %p3475_p3 = scmp.lt.u32.totalorder %s3468_s7, %s4584_s0 }
  0x67   : > { %p3471_p1 = pnand %p3470_p0, %p3469_p12 }
  0x69   : > { %p3472_p13 = pneg %p3471_p1 }
  0x6b   : > { %p3477_p4 = pnand %p3475_p3, %p3472_p13 }
  0x6d   : > { %3480 = shalt.err (!%p3477_p4)
}
  0x6e   : > { %s3481_s27 = scalar_lea.vmem %s403_s13, 512  ;;  %p3489_p6 = scmp.lt.s32.totalorder %s403_s13, %s403_s13 }
  0x6f   : > { %p3482_p11 = scmp.ne.s32.totalorder %s403_s13, %s3481_s27  ;;  %p3490_p10 = scmp.lt.s32.totalorder %s3481_s27, %s3481_s27 }
  0x71   : > { %p3484_p8 = pnand %p3482_p11, %p3470_p0  ;;  %p3491_p5 = por %p3490_p10, %p3489_p6 }
  0x73   : > { %p3485_p2 = pneg %p3484_p8 }
  0x75   : > { %p3492_p7 = pnand %p3491_p5, %p3485_p2 }
  0x77   : > { %3495 = shalt.err (!%p3492_p7)
}
  0x78   : > { %s3637_s11 = smov 128   ;;  %s3638_s12 = smov 8  }
  0x79   : > { %3197 = dma.hbm_to_vmem [thread:$0]  (!%p3873_p9), %s4584_s0, 512, %s403_s13, [#allocation5], %s3637_s11, %s3637_s11, %s3638_s12  }
  0x7a   : > { %s3496_s1 = scalar_lea.hbm %s3881_s18, 1024  ;;  %p4585_p12 = scmp.ne.s32.totalorder %s4576_s15, 0 }
  0x7b   : > { %p3497_p8 = scmp.ne.s32.totalorder %s3881_s18, %s3496_s1  ;;  %s3501_s27 = scalar_lea.hbm %s4583_s3, 2048 }
  0x7c   : > { %p3502_p5 = scmp.lt.u32.totalorder %s3881_s18, %s4583_s3  ;;  %p3503_p7 = scmp.lt.u32.totalorder %s3501_s27, %s3496_s1 }
  0x7d   : > { %p3499_p0 = pnand %p3497_p8, %p4585_p12  ;;  %p3505_p10 = scmp.lt.u32.totalorder %s3496_s1, %s3881_s18 }
  0x7e   : > { %p3504_p2 = por %p3503_p7, %p3502_p5 }
  0x7f   : > { %p3500_p6 = pneg %p3499_p0 }
  0x80   : > { %p3506_p1 = por %p3505_p10, %p3504_p2 }
  0x82   : > { %p3507_p13 = pnand %p3506_p1, %p3500_p6 }
  0x84   : > { %3510 = shalt.err (!%p3507_p13)
}
  0x85   : > { %s3511_s13 = scalar_lea.vmem %s3884_s17, 1024  ;;  %s3639_s25 = smov [#allocation9]  }
  0x86   : > { %p3512_p9 = scmp.ne.s32.totalorder %s3884_s17, %s3511_s13  ;;  %s3516_s11 = sshll.u32 %s3639_s25, 4  ;;  %s3517_s11 = int_to_ptr.vmem [resolvable:$false] %s3516_s11 }
  0x87   : > { %s3518_s8 = scalar_lea.vmem %s3517_s11, 2048  ;;  %p3519_p11 = scmp.lt.s32.totalorder %s3884_s17, %s3517_s11 }
  0x88   : > { %p3514_p3 = pnand %p3512_p9, %p4585_p12  ;;  %p3520_p8 = scmp.lt.s32.totalorder %s3518_s8, %s3511_s13 }
  0x8a   : > { %p3515_p4 = pneg %p3514_p3  ;;  %p3521_p0 = por %p3520_p8, %p3519_p11 }
  0x8c   : > { %p3522_p5 = pnand %p3521_p0, %p3515_p4 }
  0x8e   : > { %3525 = shalt.err (!%p3522_p5)
}
  0x8f   : > { %p4586_p6 = scmp.ne.s32.totalorder %s4574_s19, 0  ;;  %s4587_s10 = smov 4  }
  0x90   : > { %s4588_s12 = smov 64   ;;  %s4589_s9 = sld [smem:[#allocation27_spill]] }
  0x91   : > { %3204 = dma.hbm_to_vmem [thread:$0]  (!%p4586_p6), %s3881_s18, 1024, %s3884_s17, %s3775_s14, %s4588_s12, %s4588_s12, %s4587_s10  }
  0x92   : > { %s514_s28 = scalar_lea.vmem [#allocation12], %s3807_s20 }
  0x93   : > { %s521_s23 = sshll.u32 %s514_s28, 4  ;;  %s3934_s23 = int_to_ptr.vmem [resolvable:$true] %s521_s23 }
  0x96   : > { %s3931_s1 = scalar_lea.hbm %s4589_s9, %s3810_s16  ;;  %s3531_s17 = scalar_lea.hbm %s4589_s9, 2048 }
  0x97   : > { %s3526_s27 = scalar_lea.hbm %s3931_s1, 1024  ;;  %p3532_p1 = scmp.lt.u32.totalorder %s3931_s1, %s4589_s9 }
  0x98   : > { %p3527_p7 = scmp.ne.s32.totalorder %s3931_s1, %s3526_s27  ;;  %p3533_p13 = scmp.lt.u32.totalorder %s3531_s17, %s3526_s27 }
  0x99   : > { %p3535_p3 = scmp.lt.u32.totalorder %s3526_s27, %s3931_s1 }
  0x9a   : > { %p3529_p2 = pnand %p3527_p7, %p4585_p12  ;;  %p3534_p9 = por %p3533_p13, %p3532_p1 }
  0x9c   : > { %p3530_p10 = pneg %p3529_p2  ;;  %p3536_p4 = por %p3535_p3, %p3534_p9 }
  0x9e   : > { %p3537_p11 = pnand %p3536_p4, %p3530_p10 }
  0xa0   : > { %3540 = shalt.err (!%p3537_p11)
}
  0xa1   : > { %s3541_s20 = scalar_lea.vmem %s3934_s23, 1024  ;;  %s3640_s25 = smov [#allocation12]  }
  0xa2   : > { %p3542_p8 = scmp.ne.s32.totalorder %s3934_s23, %s3541_s20  ;;  %s3546_s11 = sshll.u32 %s3640_s25, 4  ;;  %s3547_s11 = int_to_ptr.vmem [resolvable:$false] %s3546_s11 }
  0xa3   : > { %s3548_s8 = scalar_lea.vmem %s3547_s11, 2048  ;;  %p3549_p7 = scmp.lt.s32.totalorder %s3934_s23, %s3547_s11 }
  0xa4   : > { %p3544_p0 = pnand %p3542_p8, %p4585_p12  ;;  %p3550_p2 = scmp.lt.s32.totalorder %s3548_s8, %s3541_s20 }
  0xa6   : > { %p3545_p5 = pneg %p3544_p0  ;;  %p3551_p1 = por %p3550_p2, %p3549_p7 }
  0xa8   : > { %p3552_p13 = pnand %p3551_p1, %p3545_p5 }
  0xaa   : > { %3555 = shalt.err (!%p3552_p13)
}
  0xab   : > { %3210 = dma.hbm_to_vmem [thread:$0]  (!%p4586_p6), %s3931_s1, 1024, %s3934_s23, %s3823_s30, %s4588_s12, %s4588_s12, %s4587_s10  }
  0xac   : > { %p4590_p12 = scmp.ne.s32.totalorder %s4581_s29, 0 }
  0xad   : > { %p4591_p10 = scmp.eq.s32.totalorder (!%p4590_p12), %s3851_s21, 0 }
  0xae   : > { %551 = sbr.rel (%p4590_p12) target bundleno = 2913 (0xb61), region = 72 }
  0xb5   : > { %3599 = dma.done.wait (%p4591_p10), [#allocation5], 512   ;;  %p4592_p9 = pmov %p4591_p10 }
  0xb6   : > { %s557_s15 = sand.u32 1, %s3851_s21   ;;  %s559_s19 = sand.u32 1, %s3620_s26  }
  0xb7   : > { %3601 = vsyncadd (%p4592_p9), [#allocation5], 4294966784  ;;  %s3176_s7 = smul.u32 192, %s559_s19  ;;  %s558_s24 = scalar_lea.sflag [#allocation8], %s557_s15 }
  0xb8   : > { %p4593_p3 = scmp.ne.s32.totalorder %s4580_s22, 0 }
  0xb9   : > { %s3969_s28 = scalar_lea.vmem [#allocation7], %s3176_s7 }
  0xba   : > { %3603 = dma.done.wait (%p4593_p3), %s558_s24, 4096  }
  0xbb   : > { %3605 = vsyncadd (%p4593_p3), %s558_s24, 4294963200  ;;  %s2824_s30 = sshll.u32 %s559_s19, 6  ;;  %s576_s10 = scalar_lea.sflag [#allocation11], %s557_s15 }
  0xbc   : > { %s3975_s29 = scalar_lea.vmem [#allocation9], %s2824_s30  ;;  %s3977_s12 = scalar_lea.vmem [#allocation10], %s2824_s30 }
  0xbd   : > { %3607 = dma.done.wait (%p4593_p3), %s576_s10, 2048  }
  0xbe   : > { %3609 = vsyncadd (%p4593_p3), %s576_s10, 4294965248  ;;  %p666_p6 = scmp.lt.s32.totalorder %s3851_s21, 1  ;;  %s4594_s24 = sld [smem:[#allocation26_spill]] }
  0xbf   : > { %s4595_s13 = sld [smem:[#allocation28_spill]]  ;;  %s4596_s17 = sld [smem:[#allocation29_spill]] }
  0xc0   : > { %s3985_s1 = scalar_select %p666_p6, %s3851_s21, 1 }
  0xc1   : > { %s4597_s20 = sld [smem:[#allocation30_spill]]  ;;  %s4021_s26 = scalar_lea.vmem [#allocation12], %s2824_s30 }
  0xc2   : > { %s3177_s23 = smul.u32 3, %s3985_s1  ;;  %p4598_p4 = scmp.ne.s32.totalorder %s3851_s21, 0 }
  0xc3   : > { %v696_v0 = vld [vmem:[#allocation4] sm:$0xff] (!%p4598_p4)  ;;  %v697_v1 = vld [vmem:[#allocation4 + $0x8] sm:$0xff] (!%p4598_p4)  ;;  %v698_v2 = vld [vmem:[#allocation4 + $0x10] sm:$0xff] (!%p4598_p4)  ;;  %v3641_v4 = vmov (!%p4598_p4), 0  }
  0xc4   : > { %s4003_s15 = scalar_lea.vmem %s4530_s2, %s3177_s23  ;;  %s681_s10 = scalar_lea.vmem %s4594_s24, %s3985_s1  ;;  %700 = vst [vmem:[#allocation2] sm:$0xff] (!%p4598_p4), %v696_v0  ;;  %701 = vst [vmem:[#allocation2 + $0x8] sm:$0xff] (!%p4598_p4), %v697_v1  ;;  %v699_v3 = vld [vmem:[#allocation4 + $0x18] sm:$0xff] (!%p4598_p4) }
  0xc5   : > { %s684_s14 = scalar_lea.vmem %s4595_s13, %s3985_s1  ;;  %s687_s18 = scalar_lea.vmem %s4596_s17, %s3985_s1  ;;  %702 = vst [vmem:[#allocation2 + $0x10] sm:$0xff] (!%p4598_p4), %v698_v2  ;;  %704 = vst [vmem:[#allocation3] sm:$0xff] (!%p4598_p4), %v3641_v4 }
  0xc6   : > { %695 = sbr.rel (%p4598_p4) target bundleno = 205 (0xcd), region = 96  ;;  %705 = vst [vmem:[#allocation3 + $0x8] sm:$0xff] (!%p4598_p4), %v3641_v4  ;;  %703 = vst [vmem:[#allocation2 + $0x18] sm:$0xff] (!%p4598_p4), %v699_v3 }
  0xc7   : > { %s690_s25 = scalar_lea.vmem %s4597_s20, %s3985_s1 }
  0xcd PF: > { %v3268_v5 = vld [vmem:[%s3969_s28 + $0x4] ss:$12 sps:$4 sm:$0xff]   ;;  %v3270_v6 = vld [vmem:[%s3969_s28] ss:$12 sps:$4 sm:$0xff]   ;;  %v3642_v7 = vmov 0   ;;  %v707_v15 = vld [vmem:[#allocation2 + $0x8] sm:$0xff]  ;;  %v710_v37 = vlaneseq  ;;  %s4603_s8 = scalar_lea.vmem %s4532_s4, %s3985_s1  ;;  %s4604_s19 = scalar_lea.vmem %s4533_s5, %s3985_s1 }
  0xce   : > { %924 = vmatprep.mubr.bf16.mxu0 %v3642_v7  ;;  %892 = vmatprep.subr.bf16.mxu0 %v3268_v5  ;;  %v3271_v8 = vld [vmem:[%s3969_s28 + $0x1c] ss:$12 sps:$4 sm:$0xff]   ;;  %v3273_v9 = vld [vmem:[%s3969_s28 + $0x18] ss:$12 sps:$4 sm:$0xff]   ;;  %v3274_v10 = vld [vmem:[%s3969_s28 + $0x34] ss:$12 sps:$4 sm:$0xff]   ;;  %s4605_s27 = scalar_lea.vmem %s4534_s6, %s3985_s1 }
  0xcf   : > { %893 = vmatpush1.bf16.msra.mxu0 %v3270_v6  ;;  %v3276_v11 = vld [vmem:[%s3969_s28 + $0x30] ss:$12 sps:$4 sm:$0xff]   ;;  %v3277_v12 = vld [vmem:[%s3969_s28 + $0x4c] ss:$12 sps:$4 sm:$0xff]   ;;  %v3279_v14 = vld [vmem:[%s3969_s28 + $0x48] ss:$12 sps:$4 sm:$0xff]  }
  0xd0   : > { %894 = vmatprep.subr.bf16.mxu0 %v3271_v8  ;;  %v706_v13 = vld [vmem:[#allocation2] sm:$0xff]  ;;  %v3282_v18 = vld [vmem:[%s3969_s28 + $0x60] ss:$12 sps:$4 sm:$0xff]   ;;  %v3283_v19 = vld [vmem:[%s3969_s28 + $0x7c] ss:$12 sps:$4 sm:$0xff]   ;;  %v3643_v28 = vmov 0.0  }
  0xd1   : > { %v3280_v16 = vld [vmem:[%s3969_s28 + $0x64] ss:$12 sps:$4 sm:$0xff]   ;;  %v713_v17 = vpack.c.bf16 %v707_v15, %v706_v13  ;;  %v3286_v21 = vld [vmem:[%s3969_s28 + $0x94] ss:$12 sps:$4 sm:$0xff]   ;;  %v3289_v23 = vld [vmem:[%s3969_s28 + $0xac] ss:$12 sps:$4 sm:$0xff]  }
  0xd2   : > { %v3285_v20 = vld [vmem:[%s3969_s28 + $0x78] ss:$12 sps:$4 sm:$0xff]   ;;  %v3288_v22 = vld [vmem:[%s3969_s28 + $0x90] ss:$12 sps:$4 sm:$0xff]   ;;  %v3291_v24 = vld [vmem:[%s3969_s28 + $0xa8] ss:$12 sps:$4 sm:$0xff]  }
  0xd3   : > { %895 = vmatpush1.bf16.msra.mxu0 %v3273_v9  ;;  %3014 = vmatprep.mubr.bf16.mxu1 %v713_v17  ;;  %v708_v25 = vld [vmem:[#allocation2 + $0x10] sm:$0xff]  ;;  %v709_v26 = vld [vmem:[#allocation2 + $0x18] sm:$0xff]  ;;  %vm3644_vm0 = vmmov 0   ;;  %v3295_v32 = vld [vmem:[%s3969_s28 + $0x50] ss:$12 sps:$4 sm:$0xff]   ;;  %v4056_v38 = vshrl.u32 %v710_v37, 7 }
  0xd4   : > { %896 = vmatprep.subr.bf16.mxu0 %v3274_v10  ;;  %v714_v27 = vpack.c.bf16 %v709_v26, %v708_v25  ;;  %v3292_v29 = vld [vmem:[%s3969_s28 + $0x8] ss:$12 sps:$4 sm:$0xff]   ;;  %v3293_v30 = vld [vmem:[%s3969_s28 + $0x20] ss:$12 sps:$4 sm:$0xff]   ;;  %v3294_v31 = vld [vmem:[%s3969_s28 + $0x38] ss:$12 sps:$4 sm:$0xff]  }
  0xd5   : > { %2998 = vmatprep.subr.bf16.mxu1 %v3292_v29  ;;  %v3296_v33 = vld [vmem:[%s3969_s28 + $0x68] ss:$12 sps:$4 sm:$0xff]   ;;  %v3297_v34 = vld [vmem:[%s3969_s28 + $0x80] ss:$12 sps:$4 sm:$0xff]   ;;  %v3298_v35 = vld [vmem:[%s3969_s28 + $0x98] ss:$12 sps:$4 sm:$0xff]  }
  0xd6   : > { %2999 = vmatpush3.bf16.msra.mxu1 %v3292_v29  ;;  %v3299_v36 = vld [vmem:[%s3969_s28 + $0xb0] ss:$12 sps:$4 sm:$0xff]   ;;  %v751_v39 = vsub.s32 0, %v4056_v38  ;;  %v755_v41 = vsub.s32 1, %v4056_v38  ;;  %vm1005_vm1 = vcmask 64512   ;;  %s3645_s0 = smov 112  }
  0xd7   : > { %897 = vmatpush1.bf16.msra.mxu0 %v3276_v11  ;;  %3000 = vmatprep.subr.bf16.mxu1 %v3293_v30  ;;  %v4060_v40 = vld [vmem:[%s4003_s15] sm:$0x7]  ;;  %s3646_s3 = smov 120   ;;  %s3647_s9 = smov 104   ;;  %v759_v8 = vsub.s32 2, %v4056_v38  ;;  %vm1057_vm3 = vcmask 130048  }
  0xd8   : > { %898 = vmatprep.subr.bf16.mxu0 %v3277_v12  ;;  %v752_v42 = vrot.slane %v4060_v40, %v751_v39  ;;  %v756_v44 = vrot.slane %v4060_v40, %v755_v41  ;;  %s3648_s28 = smov 8   ;;  %s3649_s30 = smov 16   ;;  %vm1260_vm5 = vcmask 130112   ;;  %vm1392_vm6 = vcmask 195712  }
  0xd9   : > { %v760_v10 = vrot.slane %v4060_v40, %v759_v8  ;;  %s3650_s23 = smov 24   ;;  %vm1524_vm7 = vcmask 261312   ;;  %p2899_p11 = scmp.ne.s32.totalorder %s3851_s21, 1 }
  0xda   : > { %3001 = vmatpush3.bf16.msra.mxu1 %v3293_v30 }
  0xdb   : > { %899 = vmatpush1.bf16.msra.mxu0 %v3279_v14  ;;  %3002 = vmatprep.subr.bf16.mxu1 %v3294_v31 }
  0xdc   : > { %900 = vmatprep.subr.bf16.mxu0 %v3280_v16 }
  0xde   : > { %3003 = vmatpush3.bf16.msra.mxu1 %v3294_v31 }
  0xdf   : > { %901 = vmatpush1.bf16.msra.mxu0 %v3282_v18  ;;  %3004 = vmatprep.subr.bf16.mxu1 %v3295_v32 }
  0xe0   : > { %902 = vmatprep.subr.bf16.mxu0 %v3283_v19 }
  0xe2   : > { %3005 = vmatpush3.bf16.msra.mxu1 %v3295_v32 }
  0xe3   : > { %903 = vmatpush1.bf16.msra.mxu0 %v3285_v20  ;;  %3006 = vmatprep.subr.bf16.mxu1 %v3296_v33 }
  0xe4   : > { %904 = vmatprep.subr.bf16.mxu0 %v3286_v21 }
  0xe6   : > { %3007 = vmatpush3.bf16.msra.mxu1 %v3296_v33  ;;  %v4123_v33 = vand.u32 127, %v710_v37 }
  0xe7   : > { %905 = vmatpush1.bf16.msra.mxu0 %v3288_v22  ;;  %3008 = vmatprep.subr.bf16.mxu1 %v3297_v34 }
  0xe8   : > { %906 = vmatprep.subr.bf16.mxu0 %v3289_v23  ;;  %vm4128_vm2 = vcmp.le.s32.totalorder %v4123_v33, %v4056_v38  ;;  %vm712_vm8 = vcmp.lt.s32.totalorder %v4123_v33, 32 }
  0xea   : > { %3009 = vmatpush3.bf16.msra.mxu1 %v3297_v34  ;;  %v1002_v34 = vadd.s32 8, %v4056_v38 }
  0xeb   : > { %907 = vmatpush1.bf16.msra.mxu0 %v3291_v24  ;;  %3010 = vmatprep.subr.bf16.mxu1 %v3298_v35 }
  0xec   : > { %3018 = vmatprep.subr.bf16.mxu0 %v3643_v28  ;;  %vm4133_vm4 = vcmp.le.s32.totalorder %v4123_v33, %v1002_v34 }
  0xee   : > { %925 = vmatmul.mubr.bf16.vlgmr.msra.gmra.mrb[0].mxu0 %v713_v17  ;;  %3011 = vmatpush3.bf16.msra.mxu1 %v3298_v35 }
  0xef   : > { %934 = vmatprep.mubr.bf16.mxu0 %v3642_v7  ;;  %3012 = vmatprep.subr.bf16.mxu1 %v3299_v36 }
  0xf2   : > { %3013 = vmatpush3.bf16.msra.mxu1 %v3299_v36 }
  0xf3   : > { %3030 = vmatprep.subr.bf16.mxu1 %v3643_v28 }
  0xf5   : > { %3015 = vmatmul.mubr.bf16.vlgmr.msra.gmra.mrb[0].mxu1 %v714_v27 }
  0xf6   : > { %935 = vmatmul.mubr.bf16.gmra.mrb[4].mxu0 %v714_v27  ;;  %3032 = vmatprep.mubr.msk.bf16.mxu1 %vm3644_vm0, %v3643_v28 }
  0xf7   : > { %3020 = vmatprep.mubr.msk.bf16.mxu0 %vm3644_vm0, %v3643_v28 }
 0x1c1   : > { %v926_v43 = vpop.f32.mrb[0].mxu0 }
 0x1c2   : > { %v928_v45 = vpop.f32.mrb[1].mxu0  ;;  %v927_v47 = vadd.f32 %v926_v43, %v752_v42 }
 0x1c3   : > { %v930_v46 = vpop.f32.mrb[2].mxu0  ;;  %v929_v50 = vadd.f32 %v928_v45, %v756_v44 }
 0x1c4   : > { %v931_v48 = vadd.f32 %v930_v46, %v752_v42  ;;  %v932_v49 = vpop.f32.mrb[3].mxu0 }
 0x1c5   : > { %v933_v51 = vadd.f32 %v932_v49, %v756_v44 }
 0x1c6   : > { %v994_v52 = vpack.c.bf16 %v931_v48, %v927_v47 }
 0x1c7   : > { %v995_v53 = vpack.c.bf16 %v933_v51, %v929_v50 }
 0x1c8   : > { %v3016_v11 = vpop.f32.mrb[0].mxu1 }
 0x1c9   : > { %1264 = vrot.lane.b32.xlu1 %v995_v53, %s3645_s0  ;;  %1131 = vrot.lane.b32.xlu0 %v995_v53, %s3646_s3  ;;  %v1010_v54 = vsel %vm1005_vm1, %v995_v53, 0  ;;  %v936_v55 = vpop.f32.mrb[4].mxu0  ;;  %v988_v13 = vadd.f32 %v3016_v11, %v760_v10  ;;  %v979_v14 = vpop.f32.mrb[1].mxu1 }
 0x1ca   : > { %3019 = vmatpush3.bf16.xpose.msra.mxu0 %v1010_v54  ;;  %v937_v56 = vadd.f32 %v936_v55, %v752_v42  ;;  %v938_v57 = vpop.f32.mrb[5].mxu0  ;;  %v980_v16 = vadd.f32 %v979_v14, %v760_v10  ;;  %v3017_v17 = vpop.f32.mrb[2].mxu1 }
 0x1cb   : > { %v939_v58 = vadd.f32 %v938_v57, %v756_v44  ;;  %v940_v59 = vpop.f32.mrb[6].mxu0  ;;  %3024 = vmatprep.subr.bf16.mxu0 %v3643_v28  ;;  %v991_v18 = vadd.f32 %v3017_v17, %v760_v10  ;;  %v982_v19 = vpop.f32.mrb[3].mxu1 }
 0x1cc   : > { %v941_v60 = vadd.f32 %v940_v59, %v752_v42  ;;  %v942_v61 = vpop.f32.mrb[7].mxu0  ;;  %v983_v20 = vadd.f32 %v982_v19, %v760_v10 }
 0x1cd   : > { %1262 = vrot.lane.b32.xlu1 %v994_v52, %s3645_s0  ;;  %1128 = vrot.lane.b32.xlu0 %v994_v52, %s3646_s3  ;;  %v943_v62 = vadd.f32 %v942_v61, %v756_v44  ;;  %v4101_v22 = vpack.c.bf16 %v991_v18, %v988_v13 }
 0x1ce   : > { %v997_v63 = vpack.c.bf16 %v941_v60, %v937_v56  ;;  %v4103_v23 = vpack.c.bf16 %v983_v20, %v980_v16 }
 0x1cf   : > { %v998_v0 = vpack.c.bf16 %v943_v62, %v939_v58 }
 0x1d1   : > { %1394 = vrot.lane.b32.xlu1 %v994_v52, %s3647_s9  ;;  %1396 = vrot.lane.b32.xlu0 %v995_v53, %s3647_s9  ;;  %v1530_v15 = vsel %vm1005_vm1, %v998_v0, 0 }
 0x1d2   : > { %3021 = vmatmul.mubr.msk.bf16.vlgmr.msra.gmra.mrb[8].mxu0 %vm1005_vm1, %v994_v52 }
 0x1d3   : > { %3026 = vmatprep.mubr.msk.bf16.mxu0 %vm3644_vm0, %v3643_v28  ;;  %3025 = vmatpush3.bf16.msra.mxu0 %v4103_v23 }
 0x1d4   : > { %3036 = vmatprep.subr.bf16.mxu0 %v3643_v28 }
 0x1d5   : > { %1650 = vrot.lane.b32.xlu0 %v998_v0, %s3646_s3  ;;  %1647 = vrot.lane.b32.xlu1 %v997_v63, %s3646_s3 }
 0x1d9   : > { %1782 = vrot.lane.b32.xlu0 %v998_v0, %s3645_s0  ;;  %1780 = vrot.lane.b32.xlu1 %v997_v63, %s3645_s0 }
 0x1dd   : > { %1913 = vrot.lane.b32.xlu0 %v998_v0, %s3647_s9  ;;  %1911 = vrot.lane.b32.xlu1 %v997_v63, %s3647_s9 }
 0x23b   : > { %v1132_v1 = vpop.permute.xlu0 %1131  ;;  %v1265_v3 = vpop.permute.xlu1 %1264 }
 0x23c   : > { %v1137_v2 = vsel %vm1005_vm1, %v1132_v1, 0  ;;  %v1270_v5 = vsel %vm1005_vm1, %v1265_v3, 0 }
 0x23d   : > { %3031 = vmatpush3.bf16.xpose.msra.mxu1 %v1137_v2 }
 0x23e   : > { %3042 = vmatprep.subr.bf16.mxu1 %v3643_v28 }
 0x23f   : > { %v1129_v4 = vpop.permute.xlu0 %1128  ;;  %v1263_v7 = vpop.permute.xlu1 %1262 }
 0x243   : > { %v1397_v6 = vpop.permute.xlu0 %1396  ;;  %v1395_v12 = vpop.permute.xlu1 %1394 }
 0x244   : > { %3033 = vmatmul.mubr.msk.bf16.vlgmr.msra.gmra.mrb[4].mxu1 %vm1005_vm1, %v1129_v4  ;;  %v1402_v9 = vsel %vm1005_vm1, %v1397_v6, 0 }
 0x245   : > { %3043 = vmatpush3.bf16.xpose.msra.mxu1 %v1270_v5  ;;  %3044 = vmatprep.mubr.msk.bf16.mxu1 %vm3644_vm0, %v3643_v28 }
 0x246   : > { %3054 = vmatprep.subr.bf16.mxu1 %v3643_v28 }
 0x247   : > { %v1651_v21 = vpop.permute.xlu0 %1650  ;;  %v1648_v26 = vpop.permute.xlu1 %1647 }
 0x248   : > { %v1656_v24 = vsel %vm1005_vm1, %v1651_v21, 0 }
 0x24b   : > { %v1783_v25 = vpop.permute.xlu0 %1782  ;;  %v1781_v30 = vpop.permute.xlu1 %1780 }
 0x24c   : > { %3045 = vmatmul.mubr.msk.bf16.vlgmr.msra.gmra.mrb[8].mxu1 %vm1005_vm1, %v1263_v7  ;;  %v1788_v27 = vsel %vm1005_vm1, %v1783_v25, 0 }
 0x24d   : > { %3055 = vmatpush3.bf16.xpose.msra.mxu1 %v1402_v9  ;;  %3056 = vmatprep.mubr.msk.bf16.mxu1 %vm3644_vm0, %v3643_v28 }
 0x24e   : > { %3066 = vmatprep.subr.bf16.mxu1 %v3643_v28 }
 0x24f   : > { %v1914_v29 = vpop.permute.xlu0 %1913  ;;  %v1912_v32 = vpop.permute.xlu1 %1911 }
 0x250   : > { %v1919_v31 = vsel %vm1005_vm1, %v1914_v29, 0 }
 0x254   : > { %3057 = vmatmul.mubr.msk.bf16.vlgmr.msra.gmra.mrb[12].mxu1 %vm1005_vm1, %v1395_v12 }
 0x255   : > { %3067 = vmatpush3.bf16.xpose.msra.mxu1 %v1530_v15  ;;  %3068 = vmatprep.mubr.msk.bf16.mxu1 %vm3644_vm0, %v3643_v28 }
 0x256   : > { %3078 = vmatprep.subr.bf16.mxu1 %v3643_v28 }
 0x25c   : > { %3069 = vmatmul.mubr.msk.bf16.vlgmr.msra.gmra.mrb[16].mxu1 %vm1005_vm1, %v997_v63 }
 0x25d   : > { %3079 = vmatpush3.bf16.xpose.msra.mxu1 %v1656_v24  ;;  %3080 = vmatprep.mubr.msk.bf16.mxu1 %vm3644_vm0, %v3643_v28 }
 0x25e   : > { %3090 = vmatprep.subr.bf16.mxu1 %v3643_v28 }
 0x264   : > { %3081 = vmatmul.mubr.msk.bf16.vlgmr.msra.gmra.mrb[20].mxu1 %vm1005_vm1, %v1648_v26 }
 0x265   : > { %3091 = vmatpush3.bf16.xpose.msra.mxu1 %v1788_v27  ;;  %3092 = vmatprep.mubr.msk.bf16.mxu1 %vm3644_vm0, %v3643_v28 }
 0x266   : > { %3102 = vmatprep.subr.bf16.mxu1 %v3643_v28 }
 0x26c   : > { %3093 = vmatmul.mubr.msk.bf16.vlgmr.msra.gmra.mrb[24].mxu1 %vm1005_vm1, %v1781_v30 }
 0x26d   : > { %3103 = vmatpush3.bf16.xpose.msra.mxu1 %v1919_v31  ;;  %3104 = vmatprep.mubr.msk.bf16.mxu1 %vm3644_vm0, %v3643_v28 }
 0x274   : > { %3105 = vmatmul.mubr.msk.bf16.vlgmr.msra.gmra.mrb[28].mxu1 %vm1005_vm1, %v1912_v32 }
 0x2a5   : > { %v1046_v35 = vpop.f32.mrb[8].mxu0 }
 0x2a6   : > { %v1053_v39 = vmul.f32 0.35355338, %v1046_v35  ;;  %v3022_v40 = vpop.f32.mrb[9].mxu0 }
 0x2a7   : > { %v1049_v41 = vpop.f32.mrb[10].mxu0 }
 0x2a8   : > { %v1054_v37 = vmul.f32 0.35355338, %v1049_v41  ;;  %v3023_v43 = vpop.f32.mrb[11].mxu0  ;;  %v4139_v44 = vsel %vm4128_vm2, %v1053_v39, -inf }
 0x2a9   : > { %v1058_v38 = vsel %vm1057_vm3, %v4139_v44, -inf }
 0x2aa   : > { %1059 = vmax.xlane.f32.xlu0 %v1058_v38  ;;  %v1056_v45 = vsel %vm4133_vm4, %v1054_v37, -inf }
 0x2ab   : > { %v1061_v46 = vsel %vm1057_vm3, %v1056_v45, -inf }
 0x2ac   : > { %1062 = vmax.xlane.f32.xlu1 %v1061_v46 }
 0x317   : > { %v1173_v47 = vpop.f32.mrb[4].mxu1 }
 0x318   : > { %v1180_v48 = vmul.f32 0.35355338, %v1173_v47  ;;  %v3034_v49 = vpop.f32.mrb[5].mxu1 }
 0x319   : > { %v1176_v50 = vpop.f32.mrb[6].mxu1 }
 0x31a   : > { %v1181_v51 = vmul.f32 0.35355338, %v1176_v50  ;;  %v3035_v52 = vpop.f32.mrb[7].mxu1  ;;  %v4148_v53 = vsel %vm4128_vm2, %v1180_v48, -inf }
 0x31b   : > { %v1184_v54 = vsel %vm1057_vm3, %v4148_v53, -inf }
 0x31c   : > { %1185 = vmax.xlane.f32.xlu0 %v1184_v54  ;;  %v4154_v55 = vsel %vm4133_vm4, %v1181_v51, -inf }
 0x31d   : > { %v1187_v57 = vsel %vm1057_vm3, %v4154_v55, -inf }
 0x31f   : > { %v1306_v56 = vpop.f32.mrb[8].mxu1 }
 0x320   : > { %v1313_v58 = vmul.f32 0.35355338, %v1306_v56  ;;  %v3046_v59 = vpop.f32.mrb[9].mxu1  ;;  %1188 = vmax.xlane.f32.xlu0 %v1187_v57 }
 0x321   : > { %v1309_v60 = vpop.f32.mrb[10].mxu1 }
 0x322   : > { %v1314_v61 = vmul.f32 0.35355338, %v1309_v60  ;;  %v3047_v62 = vpop.f32.mrb[11].mxu1  ;;  %v4160_v63 = vsel %vm4128_vm2, %v1313_v58, -inf }
 0x323   : > { %v1317_v0 = vsel %vm1057_vm3, %v4160_v63, -inf }
 0x324   : > { %1318 = vmax.xlane.f32.xlu1 %v1317_v0  ;;  %v4166_v1 = vsel %vm4133_vm4, %v1314_v61, -inf }
 0x325   : > { %v1320_v2 = vsel %vm1057_vm3, %v4166_v1, -inf }
 0x326   : > { %1321 = vmax.xlane.f32.xlu0 %v1320_v2 }
 0x327   : > { %v1438_v3 = vpop.f32.mrb[12].mxu1 }
 0x328   : > { %v1445_v4 = vmul.f32 0.35355338, %v1438_v3  ;;  %v3058_v5 = vpop.f32.mrb[13].mxu1 }
 0x329   : > { %v1441_v6 = vpop.f32.mrb[14].mxu1 }
 0x32a   : > { %v1446_v7 = vmul.f32 0.35355338, %v1441_v6  ;;  %v3059_v8 = vpop.f32.mrb[15].mxu1  ;;  %v4172_v9 = vsel %vm4128_vm2, %v1445_v4, -inf }
 0x32b   : > { %v1449_v10 = vsel %vm1057_vm3, %v4172_v9, -inf }
 0x32c   : > { %1450 = vmax.xlane.f32.xlu1 %v1449_v10  ;;  %v4178_v11 = vsel %vm4133_vm4, %v1446_v7, -inf }
 0x32d   : > { %v1452_v12 = vsel %vm1057_vm3, %v4178_v11, -inf }
 0x32e   : > { %1453 = vmax.xlane.f32.xlu0 %v1452_v12 }
 0x32f   : > { %v1566_v13 = vpop.f32.mrb[16].mxu1 }
 0x330   : > { %v3070_v14 = vpop.f32.mrb[17].mxu1  ;;  %v1573_v57 = vmul.f32 0.35355338, %v1566_v13 }
 0x331   : > { %v1569_v15 = vpop.f32.mrb[18].mxu1 }
 0x332   : > { %v1574_v16 = vmul.f32 0.35355338, %v1569_v15  ;;  %v3071_v17 = vpop.f32.mrb[19].mxu1  ;;  %v4215_v60 = vsel %vm4128_vm2, %v1573_v57, -inf }
 0x333   : > { %v1577_v62 = vsel %vm1057_vm3, %v4215_v60, -inf }
 0x334   : > { %v4184_v18 = vsel %vm4133_vm4, %v1574_v16, -inf }
 0x335   : > { %v1580_v19 = vsel %vm1057_vm3, %v4184_v18, -inf }
 0x336   : > { %1581 = vmax.xlane.f32.xlu0 %v1580_v19 }
 0x337   : > { %v1692_v20 = vpop.f32.mrb[20].mxu1  ;;  %v1060_v54 = vpop.xlane.xlu0 %1059 }
 0x338   : > { %v3082_v21 = vpop.f32.mrb[21].mxu1  ;;  %v1064_v56 = vsub.f32 %v4139_v44, %v1060_v54  ;;  %v1699_v59 = vmul.f32 0.35355338, %v1692_v20 }
 0x339   : > { %v1063_v24 = vpop.xlane.xlu1 %1062  ;;  %v1695_v25 = vpop.f32.mrb[22].mxu1 }
 0x33a   : > { %v1065_v26 = vsub.f32 %v1056_v45, %v1063_v24  ;;  %v1700_v27 = vmul.f32 0.35355338, %v1695_v25  ;;  %v3083_v29 = vpop.f32.mrb[23].mxu1  ;;  %v1066_v58 = vmul.f32 1.442695, %v1064_v56  ;;  %v4219_v42 = vsel %vm4128_vm2, %v1699_v59, -inf }
 0x33b   : > { %v1703_v44 = vsel %vm1057_vm3, %v4219_v42, -inf }
 0x33c   : > { %v1068_v30 = vmul.f32 1.442695, %v1065_v26  ;;  %v4190_v31 = vsel %vm4133_vm4, %v1700_v27, -inf }
 0x33d   : > { %1208 = vrot.lane.b32.xlu1 %v4103_v23, %s3646_s3  ;;  %v1706_v32 = vsel %vm1057_vm3, %v4190_v31, -inf }
 0x33e   : > { %3324 = vpow2.f32 %v1068_v30  ;;  %1707 = vmax.xlane.f32.xlu0 %v1706_v32 }
 0x33f   : > { %v1824_v34 = vpop.f32.mrb[24].mxu1  ;;  %3326 = vpow2.f32 %v1066_v58 }
 0x340   : > { %v3094_v35 = vpop.f32.mrb[25].mxu1  ;;  %v1831_v61 = vmul.f32 0.35355338, %v1824_v34 }
 0x341   : > { %v1827_v39 = vpop.f32.mrb[26].mxu1 }
 0x342   : > { %v1832_v40 = vmul.f32 0.35355338, %v1827_v39  ;;  %v3095_v41 = vpop.f32.mrb[27].mxu1  ;;  %v4227_v0 = vsel %vm4128_vm2, %v1831_v61, -inf }
 0x343   : > { %v1835_v2 = vsel %vm1057_vm3, %v4227_v0, -inf }
 0x344   : > { %v4198_v37 = vsel %vm4133_vm4, %v1832_v40, -inf }
 0x345   : > { %v1838_v43 = vsel %vm1057_vm3, %v4198_v37, -inf }
 0x346   : > { %1839 = vmax.xlane.f32.xlu0 %v1838_v43 }
 0x347   : > { %v1955_v38 = vpop.f32.mrb[28].mxu1 }
 0x348   : > { %v4202_v45 = vpop.eup %3324  ;;  %v3106_v46 = vpop.f32.mrb[29].mxu1  ;;  %v1962_v3 = vmul.f32 0.35355338, %v1955_v38 }
 0x349   : > { %v1958_v47 = vpop.f32.mrb[30].mxu1  ;;  %v1073_v48 = vsel %vm1057_vm3, %v4202_v45, 0.0  ;;  %v4231_v4 = vpop.eup %3326 }
 0x34a   : > { %v1963_v49 = vmul.f32 0.35355338, %v1958_v47  ;;  %1074 = vadd.xlane.f32.xlu0 %v1073_v48  ;;  %v3107_v50 = vpop.f32.mrb[31].mxu1  ;;  %v4235_v5 = vsel %vm4128_vm2, %v1962_v3, -inf  ;;  %v1070_v6 = vsel %vm1057_vm3, %v4231_v4, 0.0 }
 0x34b   : > { %v1966_v7 = vsel %vm1057_vm3, %v4235_v5, -inf }
 0x34c   : > { %v4208_v51 = vsel %vm4133_vm4, %v1963_v49, -inf }
 0x34d   : > { %v1969_v52 = vsel %vm1057_vm3, %v4208_v51, -inf }
 0x34e   : > { %1970 = vmax.xlane.f32.xlu0 %v1969_v52 }
 0x361   : > { %1578 = vmax.xlane.f32.xlu1 %v1577_v62 }
 0x365   : > { %1704 = vmax.xlane.f32.xlu1 %v1703_v44 }
 0x369   : > { %1836 = vmax.xlane.f32.xlu1 %v1835_v2 }
 0x36d   : > { %1071 = vadd.xlane.f32.xlu1 %v1070_v6 }
 0x371   : > { %1967 = vmax.xlane.f32.xlu1 %v1966_v7 }
 0x3a9   : > { %v1186_v8 = vpop.xlane.xlu0 %1185 }
 0x3aa   : > { %v1190_v10 = vsub.f32 %v4148_v53, %v1186_v8 }
 0x3ac   : > { %v1192_v12 = vmul.f32 1.442695, %v1190_v10 }
 0x3ad   : > { %v1189_v13 = vpop.xlane.xlu0 %1188 }
 0x3ae   : > { %3328 = vpow2.f32 %v1192_v12  ;;  %v1191_v14 = vsub.f32 %v4154_v55, %v1189_v13 }
 0x3b0   : > { %v1194_v15 = vmul.f32 1.442695, %v1191_v14 }
 0x3b1   : > { %v1319_v53 = vpop.xlane.xlu1 %1318 }
 0x3b2   : > { %3330 = vpow2.f32 %v1194_v15  ;;  %v1323_v55 = vsub.f32 %v4160_v63, %v1319_v53 }
 0x3b3   : > { %v1322_v20 = vpop.xlane.xlu0 %1321 }
 0x3b4   : > { %v1324_v24 = vsub.f32 %v4166_v1, %v1322_v20  ;;  %v1325_v25 = vmul.f32 1.442695, %v1323_v55 }
 0x3b6   : > { %v1327_v29 = vmul.f32 1.442695, %v1324_v24  ;;  %3332 = vpow2.f32 %v1325_v25 }
 0x3b8   : > { %v4243_v36 = vpop.eup %3328  ;;  %3334 = vpow2.f32 %v1327_v29 }
 0x3b9   : > { %v1196_v16 = vsel %vm1057_vm3, %v4243_v36, 0.0  ;;  %v1451_v21 = vpop.xlane.xlu1 %1450 }
 0x3ba   : > { %1197 = vadd.xlane.f32.xlu1 %v1196_v16  ;;  %v1455_v26 = vsub.f32 %v4172_v9, %v1451_v21 }
 0x3bb   : > { %v1454_v27 = vpop.xlane.xlu0 %1453 }
 0x3bc   : > { %v4247_v17 = vpop.eup %3330  ;;  %v1457_v30 = vmul.f32 1.442695, %v1455_v26  ;;  %v1456_v32 = vsub.f32 %v4178_v11, %v1454_v27 }
 0x3bd   : > { %v1199_v19 = vsel %vm1057_vm3, %v4247_v17, 0.0  ;;  %v4260_v39 = vpop.permute.xlu1 %1208 }
 0x3be   : > { %1200 = vadd.xlane.f32.xlu0 %v1199_v19  ;;  %3336 = vpow2.f32 %v1457_v30 }
 0x3c0   : > { %v4262_v40 = vpop.eup %3332 }
 0x3c1   : > { %v1329_v11 = vsel %vm1057_vm3, %v4262_v40, 0.0 }
 0x3c2   : > { %v4264_v9 = vpop.eup %3334 }
 0x3c3   : > { %v1582_v34 = vpop.xlane.xlu0 %1581  ;;  %v1332_v49 = vsel %vm1057_vm3, %v4264_v9, 0.0 }
 0x3c4   : > { %v1584_v35 = vsub.f32 %v4184_v18, %v1582_v34 }
 0x3c6   : > { %v1587_v63 = vmul.f32 1.442695, %v1584_v35 }
 0x3c8   : > { %v4268_v38 = vpop.eup %3336 }
 0x3c9   : > { %v1461_v50 = vsel %vm1057_vm3, %v4268_v38, 0.0 }
 0x3cb   : > { %1472 = vrot.lane.b32.xlu1 %v4103_v23, %s3647_s9  ;;  %v1708_v1 = vpop.xlane.xlu0 %1707 }
 0x3cc   : > { %v1710_v18 = vsub.f32 %v4190_v31, %v1708_v1 }
 0x3ce   : > { %v1713_v57 = vmul.f32 1.442695, %v1710_v18 }
 0x3d3   : > { %v1840_v41 = vpop.xlane.xlu0 %1839 }
 0x3d4   : > { %1340 = vrot.lane.b32.xlu0 %v4103_v23, %s3645_s0  ;;  %v1459_v23 = vmul.f32 1.442695, %v1456_v32  ;;  %v1842_v58 = vsub.f32 %v4198_v37, %v1840_v41 }
 0x3d6   : > { %3338 = vpow2.f32 %v1459_v23  ;;  %v1845_v62 = vmul.f32 1.442695, %v1842_v58 }
 0x3d7   : > { %3340 = vpow2.f32 %v1587_v63  ;;  %v1075_v56 = vpop.xlane.xlu0 %1074 }
 0x3db   : > { %v1971_v44 = vpop.xlane.xlu0 %1970 }
 0x3dc   : > { %v1973_v3 = vsub.f32 %v4208_v51, %v1971_v44 }
 0x3de   : > { %v1976_v12 = vmul.f32 1.442695, %v1973_v3 }
 0x3e0   : > { %v4276_v52 = vpop.eup %3338 }
 0x3e1   : > { %v4282_v61 = vpop.eup %3340 }
 0x3e2   : > { %v1592_v2 = vsel %vm1057_vm3, %v4282_v61, 0.0 }
 0x3ee   : > { %v1579_v43 = vpop.xlane.xlu1 %1578 }
 0x3ef   : > { %v1583_v46 = vsub.f32 %v4215_v60, %v1579_v43  ;;  %1330 = vadd.xlane.f32.xlu1 %v1329_v11  ;;  %v1464_v60 = vsel %vm1057_vm3, %v4276_v52, 0.0 }
 0x3f1   : > { %v1585_v47 = vmul.f32 1.442695, %v1583_v46 }
 0x3f2   : > { %v1705_v48 = vpop.xlane.xlu1 %1704 }
 0x3f3   : > { %3342 = vpow2.f32 %v1585_v47  ;;  %v1709_v54 = vsub.f32 %v4219_v42, %v1705_v48  ;;  %1333 = vadd.xlane.f32.xlu0 %v1332_v49  ;;  %1462 = vadd.xlane.f32.xlu1 %v1461_v50 }
 0x3f5   : > { %v1711_v31 = vmul.f32 1.442695, %v1709_v54 }
 0x3f6   : > { %v1837_v59 = vpop.xlane.xlu1 %1836 }
 0x3f7   : > { %3344 = vpow2.f32 %v1711_v31  ;;  %1465 = vadd.xlane.f32.xlu0 %v1464_v60  ;;  %v1841_v26 = vsub.f32 %v4227_v0, %v1837_v59 }
 0x3f8   : > { %3346 = vpow2.f32 %v1713_v57 }
 0x3f9   : > { %3348 = vrcp.f32 %v1075_v56  ;;  %v1843_v27 = vmul.f32 1.442695, %v1841_v26 }
 0x3fa   : > { %v1072_v42 = vpop.xlane.xlu1 %1071 }
 0x3fb   : > { %1593 = vadd.xlane.f32.xlu0 %v1592_v2  ;;  %3350 = vrcp.f32 %v1072_v42 }
 0x3fc   : > { %3352 = vpow2.f32 %v1845_v62 }
 0x3fd   : > { %v4286_v37 = vpop.eup %3342 }
 0x3fe   : > { %v1968_v6 = vpop.xlane.xlu1 %1967  ;;  %v1589_v7 = vsel %vm1057_vm3, %v4286_v37, 0.0 }
 0x3ff   : > { %v1972_v8 = vsub.f32 %v4235_v5, %v1968_v6  ;;  %1590 = vadd.xlane.f32.xlu1 %v1589_v7 }
 0x401   : > { %v4292_v10 = vpop.eup %3344  ;;  %v1974_v13 = vmul.f32 1.442695, %v1972_v8 }
 0x402   : > { %v1715_v14 = vsel %vm1057_vm3, %v4292_v10, 0.0  ;;  %v4296_v15 = vpop.eup %3346 }
 0x403   : > { %3354 = vpow2.f32 %v1974_v13  ;;  %1716 = vadd.xlane.f32.xlu0 %v1715_v14  ;;  %v3349_v16 = vpop.eup %3348  ;;  %v1718_v19 = vsel %vm1057_vm3, %v4296_v15, 0.0 }
 0x404   : > { %3356 = vpow2.f32 %v1976_v12  ;;  %v1079_v5 = vmul.f32 %v3349_v16, %v4202_v45 }
 0x405   : > { %v3351_v51 = vpop.eup %3350  ;;  %3358 = vpow2.f32 %v1843_v27 }
 0x406   : > { %v4300_v53 = vpop.eup %3352  ;;  %v1078_v55 = vmul.f32 %v3351_v51, %v4231_v4 }
 0x407   : > { %1719 = vadd.xlane.f32.xlu0 %v1718_v19  ;;  %v1850_v21 = vsel %vm1057_vm3, %v4300_v53, 0.0 }
 0x408   : > { %v1080_v20 = vpack.c.bf16 %v1079_v5, %v1078_v55 }
 0x40a   : > { %3027 = vmatmul.mubr.msk.bf16.vlgmr.msra.gmra.mrb[12].mxu0 %vm1057_vm3, %v1080_v20 }
 0x40b   : > { %1851 = vadd.xlane.f32.xlu0 %v1850_v21  ;;  %3037 = vmatpush3.bf16.msra.mxu0 %v4260_v39 }
 0x40c   : > { %3038 = vmatprep.mubr.msk.bf16.mxu0 %vm3644_vm0, %v3643_v28  ;;  %3048 = vmatprep.subr.bf16.mxu0 %v3643_v28 }
 0x40d   : > { %v4310_v24 = vpop.eup %3354 }
 0x40e   : > { %v1978_v45 = vsel %vm1057_vm3, %v4310_v24, 0.0  ;;  %v4315_v4 = vpop.eup %3356 }
 0x40f   : > { %1979 = vadd.xlane.f32.xlu0 %v1978_v45  ;;  %v1981_v25 = vsel %vm1057_vm3, %v4315_v4, 0.0  ;;  %v4324_v29 = vpop.eup %3358 }
 0x410   : > { %1727 = vrot.lane.b32.xlu1 %v4101_v22, %s3646_s3  ;;  %v1847_v30 = vsel %vm1057_vm3, %v4324_v29, 0.0 }
 0x413   : > { %1982 = vadd.xlane.f32.xlu0 %v1981_v25 }
 0x429   : > { %1858 = vrot.lane.b32.xlu0 %v4101_v22, %s3645_s0 }
 0x434   : > { %1848 = vadd.xlane.f32.xlu1 %v1847_v30 }
 0x445   : > { %1989 = vrot.lane.b32.xlu1 %v4101_v22, %s3647_s9 }
 0x447   : > { %v1198_v32 = vpop.xlane.xlu1 %1197 }
 0x448   : > { %3360 = vrcp.f32 %v1198_v32 }
 0x44b   : > { %v1201_v34 = vpop.xlane.xlu0 %1200  ;;  %v1473_v41 = vpop.permute.xlu1 %1472 }
 0x44c   : > { %3362 = vrcp.f32 %v1201_v34 }
 0x44f   : > { %v1341_v1 = vpop.permute.xlu0 %1340 }
 0x452   : > { %v3361_v23 = vpop.eup %3360 }
 0x453   : > { %v1204_v35 = vmul.f32 %v3361_v23, %v4243_v36 }
 0x456   : > { %v3363_v0 = vpop.eup %3362 }
 0x457   : > { %v1205_v63 = vmul.f32 %v3363_v0, %v4247_v17 }
 0x459   : > { %v1206_v39 = vpack.c.bf16 %v1205_v63, %v1204_v35 }
 0x45b   : > { %3039 = vmatmul.mubr.msk.bf16.vlgmr.msra.gmra.mrb[16].mxu0 %vm1057_vm3, %v1206_v39 }
 0x45c   : > { %3049 = vmatpush3.bf16.msra.mxu0 %v1341_v1  ;;  %3050 = vmatprep.mubr.msk.bf16.mxu0 %vm3644_vm0, %v3643_v28 }
 0x45d   : > { %3060 = vmatprep.subr.bf16.mxu0 %v3643_v28 }
 0x47c   : > { %v1331_v43 = vpop.xlane.xlu1 %1330 }
 0x47d   : > { %3364 = vrcp.f32 %v1331_v43 }
 0x480   : > { %v1334_v11 = vpop.xlane.xlu0 %1333  ;;  %v1463_v46 = vpop.xlane.xlu1 %1462 }
 0x481   : > { %3366 = vrcp.f32 %v1334_v11 }
 0x484   : > { %v1466_v18 = vpop.xlane.xlu0 %1465 }
 0x485   : > { %3368 = vrcp.f32 %v1466_v18  ;;  %v3300_v18 = vld [vmem:[%s3975_s29] sm:$0xff]  }
 0x486   : > { %3370 = vrcp.f32 %v1463_v46  ;;  %3114 = vmatprep.subr.bf16.mxu1 %v3300_v18 }
 0x487   : > { %v3365_v36 = vpop.eup %3364  ;;  %3115 = vmatpush3.bf16.msra.mxu1 %v3300_v18 }
 0x488   : > { %v1337_v47 = vmul.f32 %v3365_v36, %v4262_v40  ;;  %v1594_v49 = vpop.xlane.xlu0 %1593  ;;  %v3301_v36 = vld [vmem:[%s3975_s29 + $0x8] sm:$0xff]  }
 0x489   : > { %3116 = vmatprep.subr.bf16.mxu1 %v3301_v36 }
 0x48b   : > { %v3367_v17 = vpop.eup %3366  ;;  %3117 = vmatpush3.bf16.msra.mxu1 %v3301_v36 }
 0x48c   : > { %v1338_v48 = vmul.f32 %v3367_v17, %v4264_v9  ;;  %v1591_v50 = vpop.xlane.xlu1 %1590 }
 0x48d   : > { %3372 = vrcp.f32 %v1591_v50  ;;  %v3302_v50 = vld [vmem:[%s3975_s29 + $0x10] sm:$0xff]  }
 0x48e   : > { %v1339_v54 = vpack.c.bf16 %v1338_v48, %v1337_v47  ;;  %3374 = vrcp.f32 %v1594_v49  ;;  %3118 = vmatprep.subr.bf16.mxu1 %v3302_v50 }
 0x48f   : > { %v3369_v56 = vpop.eup %3368  ;;  %3119 = vmatpush3.bf16.msra.mxu1 %v3302_v50 }
 0x490   : > { %v1717_v57 = vpop.xlane.xlu0 %1716  ;;  %3051 = vmatmul.mubr.msk.bf16.vlgmr.msra.gmra.mrb[20].mxu0 %vm1057_vm3, %v1339_v54  ;;  %v3371_v58 = vpop.eup %3370  ;;  %v1470_v31 = vmul.f32 %v3369_v56, %v4276_v52  ;;  %v3303_v56 = vld [vmem:[%s3975_s29 + $0x18] sm:$0xff]  }
 0x491   : > { %3061 = vmatpush3.bf16.msra.mxu0 %v1473_v41  ;;  %3062 = vmatprep.mubr.msk.bf16.mxu0 %vm3644_vm0, %v3643_v28  ;;  %v1469_v40 = vmul.f32 %v3371_v58, %v4268_v38  ;;  %v1728_v6 = vpop.permute.xlu1 %1727 }
 0x492   : > { %3072 = vmatprep.subr.bf16.mxu0 %v3643_v28  ;;  %3120 = vmatprep.subr.bf16.mxu1 %v3303_v56 }
 0x493   : > { %v1471_v59 = vpack.c.bf16 %v1470_v31, %v1469_v40  ;;  %3121 = vmatpush3.bf16.msra.mxu1 %v3303_v56 }
 0x494   : > { %v1720_v9 = vpop.xlane.xlu0 %1719 }
 0x495   : > { %3376 = vrcp.f32 %v1720_v9  ;;  %v3304_v9 = vld [vmem:[%s3975_s29 + $0x20] sm:$0xff]  }
 0x496   : > { %3378 = vrcp.f32 %v1717_v57  ;;  %3122 = vmatprep.subr.bf16.mxu1 %v3304_v9 }
 0x497   : > { %v3373_v60 = vpop.eup %3372  ;;  %3123 = vmatpush3.bf16.msra.mxu1 %v3304_v9 }
 0x498   : > { %v1852_v62 = vpop.xlane.xlu0 %1851  ;;  %3063 = vmatmul.mubr.msk.bf16.vlgmr.msra.gmra.mrb[24].mxu0 %vm1057_vm3, %v1471_v59  ;;  %v3375_v44 = vpop.eup %3374  ;;  %v1597_v52 = vmul.f32 %v3373_v60, %v4286_v37  ;;  %v3305_v59 = vld [vmem:[%s3975_s29 + $0x28] sm:$0xff]  }
 0x499   : > { %3073 = vmatpush3.bf16.msra.mxu0 %v4101_v22  ;;  %3074 = vmatprep.mubr.msk.bf16.mxu0 %vm3644_vm0, %v3643_v28  ;;  %v1598_v38 = vmul.f32 %v3375_v44, %v4282_v61  ;;  %3380 = vrcp.f32 %v1852_v62  ;;  %v3306_v62 = vld [vmem:[%s3975_s29 + $0x30] sm:$0xff]   ;;  %v3307_v44 = vld [vmem:[%s3975_s29 + $0x38] sm:$0xff]  }
 0x49a   : > { %3084 = vmatprep.subr.bf16.mxu0 %v3643_v28  ;;  %3124 = vmatprep.subr.bf16.mxu1 %v3305_v59 }
 0x49b   : > { %v1599_v2 = vpack.c.bf16 %v1598_v38, %v1597_v52  ;;  %3125 = vmatpush3.bf16.msra.mxu1 %v3305_v59  ;;  %v3309_v59 = vld [vmem:[%s3977_s12 + $0x8] sm:$0xff]  }
 0x49c   : > { %v1980_v42 = vpop.xlane.xlu0 %1979  ;;  %3126 = vmatprep.subr.bf16.mxu1 %v3306_v62 }
 0x49f   : > { %v3377_v3 = vpop.eup %3376  ;;  %3127 = vmatpush3.bf16.msra.mxu1 %v3306_v62  ;;  %v3311_v62 = vld [vmem:[%s3977_s12 + $0x18] sm:$0xff]  }
 0x4a0   : > { %3075 = vmatmul.mubr.msk.bf16.vlgmr.msra.gmra.mrb[28].mxu0 %vm1057_vm3, %v1599_v2  ;;  %v3379_v7 = vpop.eup %3378  ;;  %v1724_v22 = vmul.f32 %v3377_v3, %v4296_v15  ;;  %v1983_v8 = vpop.xlane.xlu0 %1982  ;;  %3128 = vmatprep.subr.bf16.mxu1 %v3307_v44 }
 0x4a1   : > { %3085 = vmatpush3.bf16.msra.mxu0 %v1728_v6  ;;  %3086 = vmatprep.mubr.msk.bf16.mxu0 %vm3644_vm0, %v3643_v28  ;;  %v1723_v37 = vmul.f32 %v3379_v7, %v4292_v10 }
 0x4a2   : > { %3096 = vmatprep.subr.bf16.mxu0 %v3643_v28 }
 0x4a3   : > { %v1725_v12 = vpack.c.bf16 %v1724_v22, %v1723_v37  ;;  %v3381_v14 = vpop.eup %3380  ;;  %3129 = vmatpush3.bf16.msra.mxu1 %v3307_v44  ;;  %v3312_v44 = vld [vmem:[%s3977_s12 + $0x20] sm:$0xff]  }
 0x4a4   : > { %v1859_v61 = vpop.permute.xlu0 %1858  ;;  %v1856_v16 = vmul.f32 %v3381_v14, %v4300_v53 }
 0x4a8   : > { %3087 = vmatmul.mubr.msk.bf16.vlgmr.msra.gmra.mrb[32].mxu0 %vm1057_vm3, %v1725_v12 }
 0x4a9   : > { %3097 = vmatpush3.bf16.msra.mxu0 %v1859_v61  ;;  %3098 = vmatprep.mubr.msk.bf16.mxu0 %vm3644_vm0, %v3643_v28 }
 0x4aa   : > { %3108 = vmatprep.subr.bf16.mxu0 %v3643_v28 }
 0x4c1   : > { %v1849_v13 = vpop.xlane.xlu1 %1848 }
 0x4c2   : > { %3382 = vrcp.f32 %v1849_v13 }
 0x4c3   : > { %3384 = vrcp.f32 %v1983_v8 }
 0x4c4   : > { %3386 = vrcp.f32 %v1980_v42 }
 0x4c5   : > { %v1990_v5 = vpop.permute.xlu1 %1989 }
 0x4cc   : > { %v3383_v15 = vpop.eup %3382 }
 0x4cd   : > { %v1855_v10 = vmul.f32 %v3383_v15, %v4324_v29  ;;  %v3385_v19 = vpop.eup %3384 }
 0x4ce   : > { %v3387_v55 = vpop.eup %3386  ;;  %v1987_v20 = vmul.f32 %v3385_v19, %v4315_v4 }
 0x4cf   : > { %v1857_v51 = vpack.c.bf16 %v1856_v16, %v1855_v10  ;;  %v1986_v21 = vmul.f32 %v3387_v55, %v4310_v24 }
 0x4d1   : > { %3099 = vmatmul.mubr.msk.bf16.vlgmr.msra.gmra.mrb[36].mxu0 %vm1057_vm3, %v1857_v51  ;;  %v1988_v45 = vpack.c.bf16 %v1987_v20, %v1986_v21  ;;  %v2868_v51 = vld [vmem:[%s4603_s8] ss:$0 sm:$0xff] }
 0x4d2   : > { %3109 = vmatpush3.bf16.msra.mxu0 %v1990_v5  ;;  %3110 = vmatprep.mubr.msk.bf16.mxu0 %vm3644_vm0, %v3643_v28 }
 0x4d9   : > { %3111 = vmatmul.mubr.msk.bf16.vlgmr.msra.gmra.mrb[40].mxu0 %vm1057_vm3, %v1988_v45 }
 0x4dd   : > { %v1118_v53 = vpop.f32.mrb[12].mxu0 }
 0x4de   : > { %v3028_v25 = vpop.f32.mrb[13].mxu0 }
 0x4df   : > { %v1121_v26 = vpop.f32.mrb[14].mxu0  ;;  %v3404_v25 = vld [vmem:[#allocation2] sm:$0xff] }
 0x4e0   : > { %v1125_v27 = vpack.c.bf16 %v1121_v26, %v1118_v53  ;;  %v3029_v29 = vpop.f32.mrb[15].mxu0 }
 0x4e2   : > { %1126 = vst.msk [vmem:[#allocation3] sm:$0xff] %vm1005_vm1, %v1125_v27 }
 0x52e   : > { %v1248_v30 = vpop.f32.mrb[16].mxu0 }
 0x52f   : > { %v3040_v32 = vpop.f32.mrb[17].mxu0 }
 0x530   : > { %v1251_v34 = vpop.f32.mrb[18].mxu0 }
 0x531   : > { %v1255_v23 = vpack.c.bf16 %v1251_v34, %v1248_v30  ;;  %v3041_v0 = vpop.f32.mrb[19].mxu0  ;;  %v3405_v30 = vld [vmem:[#allocation2 + $0x8] sm:$0xff]  ;;  %v3406_v34 = vld [vmem:[#allocation2 + $0x10] sm:$0xff] }
 0x533   : > { %1257 = vrot.lane.b32.xlu1 %v1255_v23, %s3648_s28 }
 0x563   : > { %v1380_v28 = vpop.f32.mrb[20].mxu0 }
 0x564   : > { %v3052_v24 = vpop.f32.mrb[21].mxu0 }
 0x565   : > { %v1383_v4 = vpop.f32.mrb[22].mxu0  ;;  %v3407_v24 = vld [vmem:[#allocation2 + $0x18] sm:$0xff] }
 0x566   : > { %v1387_v35 = vpack.c.bf16 %v1383_v4, %v1380_v28  ;;  %v3053_v63 = vpop.f32.mrb[23].mxu0 }
 0x567   : > { %v3308_v63 = vld [vmem:[%s3977_s12] sm:$0xff]  }
 0x568   : > { %1389 = vrot.lane.b32.xlu1 %v1387_v35, %s3649_s30  ;;  %3134 = vmatprep.subr.bf16.mxu0 %v3308_v63 }
 0x569   : > { %3135 = vmatpush3.bf16.msra.mxu0 %v3308_v63 }
 0x56a   : > { %3136 = vmatprep.subr.bf16.mxu0 %v3309_v59 }
 0x56b   : > { %v1512_v39 = vpop.f32.mrb[24].mxu0 }
 0x56c   : > { %v3064_v1 = vpop.f32.mrb[25].mxu0 }
 0x56d   : > { %v1515_v41 = vpop.f32.mrb[26].mxu0  ;;  %3137 = vmatpush3.bf16.msra.mxu0 %v3309_v59 }
 0x56e   : > { %v1519_v43 = vpack.c.bf16 %v1515_v41, %v1512_v39  ;;  %v3065_v11 = vpop.f32.mrb[27].mxu0 }
 0x570   : > { %1521 = vrot.lane.b32.xlu1 %v1519_v43, %s3650_s23 }
 0x573   : > { %v1637_v46 = vpop.f32.mrb[28].mxu0 }
 0x574   : > { %v3076_v17 = vpop.f32.mrb[29].mxu0 }
 0x575   : > { %v1640_v47 = vpop.f32.mrb[30].mxu0 }
 0x576   : > { %v1644_v48 = vpack.c.bf16 %v1640_v47, %v1637_v46  ;;  %v3077_v49 = vpop.f32.mrb[31].mxu0 }
 0x578   : > { %1645 = vst.msk [vmem:[#allocation3 + $0x8] sm:$0xff] %vm1005_vm1, %v1644_v48 }
 0x57b   : > { %v1767_v54 = vpop.f32.mrb[32].mxu0 }
 0x57c   : > { %v3088_v57 = vpop.f32.mrb[33].mxu0 }
 0x57d   : > { %v1770_v58 = vpop.f32.mrb[34].mxu0 }
 0x57e   : > { %v1774_v31 = vpack.c.bf16 %v1770_v58, %v1767_v54  ;;  %v3089_v40 = vpop.f32.mrb[35].mxu0 }
 0x580   : > { %1776 = vrot.lane.b32.xlu1 %v1774_v31, %s3648_s28 }
 0x5a4   : > { %v1898_v60 = vpop.f32.mrb[36].mxu0 }
 0x5a5   : > { %v1258_v52 = vpop.permute.xlu1 %1257  ;;  %v3100_v38 = vpop.f32.mrb[37].mxu0 }
 0x5a6   : > { %1261 = vst.msk [vmem:[#allocation3] sm:$0xff] %vm1260_vm5, %v1258_v52  ;;  %v1901_v42 = vpop.f32.mrb[38].mxu0  ;;  %v3313_v52 = vld [vmem:[%s3977_s12 + $0x28] sm:$0xff]   ;;  %v3314_v38 = vld [vmem:[%s3977_s12 + $0x30] sm:$0xff]  }
 0x5a7   : > { %v1905_v2 = vpack.c.bf16 %v1901_v42, %v1898_v60  ;;  %v3101_v3 = vpop.f32.mrb[39].mxu0  ;;  %v3310_v60 = vld [vmem:[%s3977_s12 + $0x10] sm:$0xff]   ;;  %v3315_v42 = vld [vmem:[%s3977_s12 + $0x38] sm:$0xff]  }
 0x5a8   : > { %3138 = vmatprep.subr.bf16.mxu0 %v3310_v60  ;;  %v3317_v3 = vld [vmem:[%s4021_s26 + $0x8] sm:$0xff]  }
 0x5a9   : > { %1907 = vrot.lane.b32.xlu0 %v1905_v2, %s3649_s30  ;;  %3139 = vmatpush3.bf16.msra.mxu0 %v3310_v60  ;;  %v3316_v2 = vld [vmem:[%s4021_s26] sm:$0xff]  }
 0x5aa   : > { %3140 = vmatprep.subr.bf16.mxu0 %v3311_v62  ;;  %3154 = vmatprep.subr.bf16.mxu1 %v3316_v2 }
 0x5ac   : > { %v2029_v6 = vpop.f32.mrb[40].mxu0 }
 0x5ad   : > { %v3112_v7 = vpop.f32.mrb[41].mxu0  ;;  %3141 = vmatpush3.bf16.msra.mxu0 %v3311_v62 }
 0x5ae   : > { %v2032_v22 = vpop.f32.mrb[42].mxu0  ;;  %3142 = vmatprep.subr.bf16.mxu0 %v3312_v44  ;;  %v3319_v7 = vld [vmem:[%s4021_s26 + $0x18] sm:$0xff]  }
 0x5af   : > { %v2036_v8 = vpack.c.bf16 %v2032_v22, %v2029_v6  ;;  %v3113_v37 = vpop.f32.mrb[43].mxu0  ;;  %v3318_v6 = vld [vmem:[%s4021_s26 + $0x10] sm:$0xff]   ;;  %v3320_v22 = vld [vmem:[%s4021_s26 + $0x20] sm:$0xff]  }
 0x5b1   : > { %2038 = vrot.lane.b32.xlu1 %v2036_v8, %s3650_s23  ;;  %3143 = vmatpush3.bf16.msra.mxu0 %v3312_v44  ;;  %v3321_v8 = vld [vmem:[%s4021_s26 + $0x28] sm:$0xff]  }
 0x5b2   : > { %3144 = vmatprep.subr.bf16.mxu0 %v3313_v52 }
 0x5b5   : > { %3145 = vmatpush3.bf16.msra.mxu0 %v3313_v52 }
 0x5b6   : > { %3146 = vmatprep.subr.bf16.mxu0 %v3314_v38 }
 0x5b9   : > { %3147 = vmatpush3.bf16.msra.mxu0 %v3314_v38 }
 0x5ba   : > { %3148 = vmatprep.subr.bf16.mxu0 %v3315_v42 }
 0x5bd   : > { %3149 = vmatpush3.bf16.msra.mxu0 %v3315_v42 }
 0x5da   : > { %v1390_v12 = vpop.permute.xlu1 %1389 }
 0x5db   : > { %1393 = vst.msk [vmem:[#allocation3] sm:$0xff] %vm1392_vm6, %v1390_v12 }
 0x5e2   : > { %v1522_v61 = vpop.permute.xlu1 %1521 }
 0x5e3   : > { %1525 = vst.msk [vmem:[#allocation3] sm:$0xff] %vm1524_vm7, %v1522_v61 }
 0x5ea   : > { %v2042_v13 = vld [vmem:[#allocation3] sm:$0xff] }
 0x5eb   : > { %3130 = vmatprep.mubr.bf16.mxu1 %v2042_v13 }
 0x5f2   : > { %v1777_v14 = vpop.permute.xlu1 %1776 }
 0x5f3   : > { %1779 = vst.msk [vmem:[#allocation3 + $0x8] sm:$0xff] %vm1260_vm5, %v1777_v14 }
 0x61b   : > { %v1908_v15 = vpop.permute.xlu0 %1907 }
 0x61c   : > { %1910 = vst.msk [vmem:[#allocation3 + $0x8] sm:$0xff] %vm1392_vm6, %v1908_v15 }
 0x623   : > { %v2039_v16 = vpop.permute.xlu1 %2038 }
 0x624   : > { %2041 = vst.msk [vmem:[#allocation3 + $0x8] sm:$0xff] %vm1524_vm7, %v2039_v16 }
 0x62b   : > { %v2043_v10 = vld [vmem:[#allocation3 + $0x8] sm:$0xff] }
 0x62c   : > { %3131 = vmatmul.mubr.bf16.vlgmr.msra.gmra.mrb[32].mxu1 %v2043_v10 }
 0x62d   : > { %3155 = vmatpush3.bf16.msra.mxu1 %v3316_v2 }
 0x62e   : > { %3156 = vmatprep.subr.bf16.mxu1 %v3317_v3 }
 0x631   : > { %3157 = vmatpush3.bf16.msra.mxu1 %v3317_v3 }
 0x632   : > { %3158 = vmatprep.subr.bf16.mxu1 %v3318_v6 }
 0x635   : > { %3159 = vmatpush3.bf16.msra.mxu1 %v3318_v6 }
 0x636   : > { %3160 = vmatprep.subr.bf16.mxu1 %v3319_v7 }
 0x639   : > { %3161 = vmatpush3.bf16.msra.mxu1 %v3319_v7 }
 0x63a   : > { %3162 = vmatprep.subr.bf16.mxu1 %v3320_v22 }
 0x63d   : > { %3163 = vmatpush3.bf16.msra.mxu1 %v3320_v22 }
 0x63e   : > { %3164 = vmatprep.subr.bf16.mxu1 %v3321_v8 }
 0x641   : > { %3165 = vmatpush3.bf16.msra.mxu1 %v3321_v8 }
 0x6ff   : > { %v3132_v19 = vpop.f32.mrb[32].mxu1 }
 0x700   : > { %v2149_v5 = vpop.f32.mrb[33].mxu1  ;;  %v2158_v55 = vadd.f32 %v3132_v19, %v2868_v51 }
 0x701   : > { %v2150_v20 = vadd.f32 %v2868_v51, %v2149_v5  ;;  %v3133_v21 = vpop.f32.mrb[34].mxu1 }
 0x702   : > { %v2152_v45 = vpop.f32.mrb[35].mxu1  ;;  %v2161_v27 = vadd.f32 %v3133_v21, %v2868_v51  ;;  %v2166_v23 = vadd.f32 %v3406_v34, %v2158_v55  ;;  %v2877_v21 = vld [vmem:[%s4604_s19] ss:$0 sm:$0xff] }
 0x703   : > { %v2153_v53 = vadd.f32 %v2868_v51, %v2152_v45  ;;  %v2164_v26 = vadd.f32 %v3404_v25, %v2150_v20 }
 0x704   : > { %v2174_v28 = vsel %vm712_vm8, %v2166_v23, 0.0  ;;  %v2167_v4 = vadd.f32 %v3407_v24, %v2161_v27 }
 0x705   : > { %v2172_v29 = vsel %vm712_vm8, %v2164_v26, 0.0  ;;  %v2165_v32 = vadd.f32 %v3405_v30, %v2153_v53 }
 0x706   : > { %2176 = vadd.xlane.f32.xlu0 %v2172_v29  ;;  %v2175_v35 = vsel %vm712_vm8, %v2167_v4, 0.0  ;;  %v2878_v29 = vld [vmem:[%s4605_s27] ss:$0 sm:$0xff] }
 0x707   : > { %v2173_v0 = vsel %vm712_vm8, %v2165_v32, 0.0 }
 0x708   : > { %2178 = vadd.xlane.f32.xlu1 %v2173_v0 }
 0x70a   : > { %2180 = vadd.xlane.f32.xlu0 %v2174_v28 }
 0x70e   : > { %2182 = vadd.xlane.f32.xlu0 %v2175_v35 }
 0x793   : > { %v2177_v39 = vpop.xlane.xlu0 %2176 }
 0x794   : > { %v2185_v1 = vmul.f32 0.03125, %v2177_v39 }
 0x795   : > { %v2179_v41 = vpop.xlane.xlu1 %2178 }
 0x796   : > { %v2189_v43 = vsub.f32 %v2164_v26, %v2185_v1  ;;  %v2186_v11 = vmul.f32 0.03125, %v2179_v41  ;;  %v3322_v41 = vld [vmem:[%s4021_s26 + $0x30] sm:$0xff]  }
 0x797   : > { %v2181_v46 = vpop.xlane.xlu0 %2180  ;;  %3166 = vmatprep.subr.bf16.mxu1 %v3322_v41 }
 0x798   : > { %v2190_v18 = vsub.f32 %v2165_v32, %v2186_v11  ;;  %v2187_v36 = vmul.f32 0.03125, %v2181_v46  ;;  %v4404_v17 = vsel %vm712_vm8, %v2189_v43, 0.0  ;;  %3167 = vmatpush3.bf16.msra.mxu1 %v3322_v41  ;;  %v3323_v43 = vld [vmem:[%s4021_s26 + $0x38] sm:$0xff]   ;;  %v2879_v11 = vld [vmem:[%s681_s10] ss:$0 sm:$0xff] }
 0x799   : > { %v2197_v47 = vmul.f32 %v4404_v17, %v4404_v17  ;;  %3168 = vmatprep.subr.bf16.mxu1 %v3323_v43 }
 0x79a   : > { %v2191_v48 = vsub.f32 %v2166_v23, %v2187_v36  ;;  %v4410_v49 = vsel %vm712_vm8, %v2190_v18, 0.0 }
 0x79b   : > { %2201 = vadd.xlane.f32.xlu1 %v2197_v47  ;;  %v2183_v50 = vpop.xlane.xlu0 %2182  ;;  %v2198_v54 = vmul.f32 %v4410_v49, %v4410_v49 }
 0x79c   : > { %v2188_v56 = vmul.f32 0.03125, %v2183_v50  ;;  %v4416_v57 = vsel %vm712_vm8, %v2191_v48, 0.0  ;;  %3169 = vmatpush3.bf16.msra.mxu1 %v3323_v43 }
 0x79d   : > { %2203 = vadd.xlane.f32.xlu0 %v2198_v54  ;;  %v2199_v58 = vmul.f32 %v4416_v57, %v4416_v57 }
 0x79e   : > { %v2192_v31 = vsub.f32 %v2167_v4, %v2188_v56 }
 0x79f   : > { %2205 = vadd.xlane.f32.xlu1 %v2199_v58 }
 0x7a0   : > { %v4422_v40 = vsel %vm712_vm8, %v2192_v31, 0.0 }
 0x7a1   : > { %v2200_v9 = vmul.f32 %v4422_v40, %v4422_v40 }
 0x7a3   : > { %2207 = vadd.xlane.f32.xlu0 %v2200_v9  ;;  %v2888_v9 = vld [vmem:[%s684_s14] ss:$0 sm:$0xff] }
 0x828   : > { %v2202_v37 = vpop.xlane.xlu1 %2201 }
 0x829   : > { %v2209_v12 = vmul.f32 0.03125, %v2202_v37 }
 0x82a   : > { %v2204_v61 = vpop.xlane.xlu0 %2203 }
 0x82b   : > { %v2213_v13 = vadd.f32 1e-05, %v2209_v12  ;;  %v2210_v14 = vmul.f32 0.03125, %v2204_v61 }
 0x82c   : > { %v2206_v15 = vpop.xlane.xlu1 %2205 }
 0x82d   : > { %3388 = vrsqrt.f32 %v2213_v13  ;;  %v2214_v16 = vadd.f32 1e-05, %v2210_v14  ;;  %v2211_v10 = vmul.f32 0.03125, %v2206_v15 }
 0x82f   : > { %3390 = vrsqrt.f32 %v2214_v16  ;;  %v2215_v51 = vadd.f32 1e-05, %v2211_v10 }
 0x830   : > { %v2208_v19 = vpop.xlane.xlu0 %2207 }
 0x831   : > { %3392 = vrsqrt.f32 %v2215_v51  ;;  %v2212_v5 = vmul.f32 0.03125, %v2208_v19 }
 0x833   : > { %v2216_v55 = vadd.f32 1e-05, %v2212_v5 }
 0x835   : > { %3394 = vrsqrt.f32 %v2216_v55 }
 0x837   : > { %v3389_v20 = vpop.eup %3388 }
 0x838   : > { %v2221_v45 = vmul.f32 %v3389_v20, %v4404_v17 }
 0x839   : > { %v3391_v53 = vpop.eup %3390 }
 0x83a   : > { %v2222_v25 = vmul.f32 %v3391_v53, %v4410_v49  ;;  %v2231_v26 = vmul.f32 %v2877_v21, %v2221_v45 }
 0x83b   : > { %v3393_v27 = vpop.eup %3392 }
 0x83c   : > { %v2223_v30 = vmul.f32 %v3393_v27, %v4416_v57  ;;  %v2232_v32 = vmul.f32 %v2877_v21, %v2222_v25  ;;  %v2241_v34 = vadd.f32 %v2878_v29, %v2231_v26 }
 0x83e   : > { %v2242_v23 = vadd.f32 %v2878_v29, %v2232_v32  ;;  %v2233_v4 = vmul.f32 %v2877_v21, %v2223_v30 }
 0x83f   : > { %v3395_v0 = vpop.eup %3394 }
 0x840   : > { %v2224_v28 = vmul.f32 %v3395_v0, %v4422_v40  ;;  %v2245_v24 = vpack.c.bf16 %v2242_v23, %v2241_v34  ;;  %v2243_v63 = vadd.f32 %v2878_v29, %v2233_v4 }
 0x842   : > { %3150 = vmatprep.mubr.bf16.mxu0 %v2245_v24  ;;  %v2234_v35 = vmul.f32 %v2877_v21, %v2224_v28 }
 0x844   : > { %v2244_v39 = vadd.f32 %v2878_v29, %v2234_v35 }
 0x846   : > { %v2246_v1 = vpack.c.bf16 %v2244_v39, %v2243_v63 }
 0x848   : > { %3151 = vmatmul.mubr.bf16.vlgmr.msra.gmra.mrb[44].mxu0 %v2246_v1 }
 0x91b   : > { %v3152_v46 = vpop.f32.mrb[44].mxu0 }
 0x91c   : > { %v2361_v18 = vadd.f32 %v3152_v46, %v2879_v11  ;;  %v2352_v36 = vpop.f32.mrb[45].mxu0  ;;  %v2897_v46 = vld [vmem:[%s687_s18] ss:$0 sm:$0xff] }
 0x91d   : > { %v2353_v17 = vadd.f32 %v2879_v11, %v2352_v36  ;;  %v3153_v47 = vpop.f32.mrb[46].mxu0 }
 0x91e   : > { %v2364_v48 = vadd.f32 %v3153_v47, %v2879_v11  ;;  %v2355_v49 = vpop.f32.mrb[47].mxu0  ;;  %v2369_v54 = vmax.f32 %v2361_v18, 0.0 }
 0x91f   : > { %v2356_v50 = vadd.f32 %v2879_v11, %v2355_v49  ;;  %v2367_v57 = vmax.f32 %v2353_v17, 0.0  ;;  %v2898_v17 = vld [vmem:[%s690_s25] ss:$0 sm:$0xff] }
 0x920   : > { %v2370_v56 = vmax.f32 %v2364_v48, 0.0 }
 0x921   : > { %v2368_v58 = vmax.f32 %v2356_v50, 0.0 }
 0x922   : > { %v2372_v31 = vpack.c.bf16 %v2370_v56, %v2369_v54 }
 0x923   : > { %v2371_v40 = vpack.c.bf16 %v2368_v58, %v2367_v57 }
 0x925   : > { %3170 = vmatprep.mubr.bf16.mxu1 %v2371_v40 }
 0x926   : > { %3171 = vmatmul.mubr.bf16.vlgmr.msra.gmra.mrb[36].mxu1 %v2372_v31 }
 0x9f9   : > { %v3172_v59 = vpop.f32.mrb[36].mxu1 }
 0x9fa   : > { %v2478_v60 = vpop.f32.mrb[37].mxu1  ;;  %v2487_v62 = vadd.f32 %v3172_v59, %v2888_v9 }
 0x9fb   : > { %v2479_v44 = vadd.f32 %v2888_v9, %v2478_v60  ;;  %v3173_v52 = vpop.f32.mrb[38].mxu1 }
 0x9fc   : > { %v2481_v38 = vpop.f32.mrb[39].mxu1  ;;  %v2490_v42 = vadd.f32 %v3173_v52, %v2888_v9  ;;  %v2495_v22 = vadd.f32 %v2487_v62, %v2243_v63 }
 0x9fd   : > { %v2482_v2 = vadd.f32 %v2888_v9, %v2481_v38  ;;  %v2493_v3 = vadd.f32 %v2479_v44, %v2241_v34 }
 0x9fe   : > { %v2496_v37 = vadd.f32 %v2490_v42, %v2244_v39  ;;  %v2501_v12 = vsel %vm712_vm8, %v2495_v22, 0.0 }
 0x9ff   : > { %v2499_v6 = vsel %vm712_vm8, %v2493_v3, 0.0  ;;  %v2494_v7 = vadd.f32 %v2482_v2, %v2242_v23 }
 0xa00   : > { %2503 = vadd.xlane.f32.xlu1 %v2499_v6  ;;  %v2502_v61 = vsel %vm712_vm8, %v2496_v37, 0.0 }
 0xa01   : > { %v2500_v8 = vsel %vm712_vm8, %v2494_v7, 0.0 }
 0xa02   : > { %2505 = vadd.xlane.f32.xlu0 %v2500_v8 }
 0xa04   : > { %2507 = vadd.xlane.f32.xlu1 %v2501_v12 }
 0xa06   : > { %2509 = vadd.xlane.f32.xlu0 %v2502_v61 }
 0xa8d   : > { %v2504_v13 = vpop.xlane.xlu1 %2503 }
 0xa8e   : > { %v2511_v14 = vmul.f32 0.03125, %v2504_v13 }
 0xa8f   : > { %v2506_v15 = vpop.xlane.xlu0 %2505 }
 0xa90   : > { %v2515_v16 = vsub.f32 %v2493_v3, %v2511_v14  ;;  %v2512_v10 = vmul.f32 0.03125, %v2506_v15 }
 0xa91   : > { %v2508_v51 = vpop.xlane.xlu1 %2507 }
 0xa92   : > { %v2516_v19 = vsub.f32 %v2494_v7, %v2512_v10  ;;  %v2513_v5 = vmul.f32 0.03125, %v2508_v51  ;;  %v2519_v55 = vsel %vm712_vm8, %v2515_v16, 0.0 }
 0xa93   : > { %v2510_v20 = vpop.xlane.xlu0 %2509  ;;  %v2523_v21 = vmul.f32 %v2519_v55, %v2519_v55 }
 0xa94   : > { %v2517_v45 = vsub.f32 %v2495_v22, %v2513_v5  ;;  %v2514_v53 = vmul.f32 0.03125, %v2510_v20  ;;  %v2520_v25 = vsel %vm712_vm8, %v2516_v19, 0.0 }
 0xa95   : > { %2527 = vadd.xlane.f32.xlu1 %v2523_v21  ;;  %v2524_v26 = vmul.f32 %v2520_v25, %v2520_v25 }
 0xa96   : > { %v2518_v27 = vsub.f32 %v2496_v37, %v2514_v53  ;;  %v2521_v29 = vsel %vm712_vm8, %v2517_v45, 0.0 }
 0xa97   : > { %2529 = vadd.xlane.f32.xlu0 %v2524_v26  ;;  %v2525_v30 = vmul.f32 %v2521_v29, %v2521_v29 }
 0xa98   : > { %v2522_v32 = vsel %vm712_vm8, %v2518_v27, 0.0 }
 0xa99   : > { %2531 = vadd.xlane.f32.xlu1 %v2525_v30  ;;  %v2526_v34 = vmul.f32 %v2522_v32, %v2522_v32 }
 0xa9b   : > { %2533 = vadd.xlane.f32.xlu0 %v2526_v34 }
 0xb22   : > { %v2528_v23 = vpop.xlane.xlu1 %2527 }
 0xb23   : > { %v2535_v0 = vmul.f32 0.03125, %v2528_v23 }
 0xb24   : > { %v2530_v28 = vpop.xlane.xlu0 %2529 }
 0xb25   : > { %v2539_v24 = vadd.f32 1e-05, %v2535_v0  ;;  %v2536_v4 = vmul.f32 0.03125, %v2530_v28 }
 0xb26   : > { %v2532_v35 = vpop.xlane.xlu1 %2531 }
 0xb27   : > { %3396 = vrsqrt.f32 %v2539_v24  ;;  %v2540_v63 = vadd.f32 1e-05, %v2536_v4  ;;  %v2537_v39 = vmul.f32 0.03125, %v2532_v35 }
 0xb28   : > { %v2534_v1 = vpop.xlane.xlu0 %2533 }
 0xb29   : > { %3398 = vrsqrt.f32 %v2540_v63  ;;  %v2541_v41 = vadd.f32 1e-05, %v2537_v39  ;;  %v2538_v43 = vmul.f32 0.03125, %v2534_v1 }
 0xb2b   : > { %3400 = vrsqrt.f32 %v2541_v41  ;;  %v2542_v33 = vadd.f32 1e-05, %v2538_v43 }
 0xb2d   : > { %3402 = vrsqrt.f32 %v2542_v33 }
 0xb31   : > { %v3397_v11 = vpop.eup %3396 }
 0xb32   : > { %v2547_v18 = vmul.f32 %v3397_v11, %v2519_v55 }
 0xb33   : > { %v3399_v36 = vpop.eup %3398 }
 0xb34   : > { %v2557_v47 = vmul.f32 %v2897_v46, %v2547_v18  ;;  %v2548_v48 = vmul.f32 %v3399_v36, %v2520_v25 }
 0xb35   : > { %v3401_v49 = vpop.eup %3400 }
 0xb36   : > { %v2567_v50 = vadd.f32 %v2898_v17, %v2557_v47  ;;  %v2558_v54 = vmul.f32 %v2897_v46, %v2548_v48  ;;  %v2549_v56 = vmul.f32 %v3401_v49, %v2521_v29 }
 0xb37   : > { %v3403_v57 = vpop.eup %3402 }
 0xb38   : > { %2571 = vst [vmem:[#allocation2] sm:$0xff] %v2567_v50  ;;  %v2568_v58 = vadd.f32 %v2898_v17, %v2558_v54  ;;  %v2559_v31 = vmul.f32 %v2897_v46, %v2549_v56  ;;  %v2550_v40 = vmul.f32 %v3403_v57, %v2522_v32  ;;  %2578 = sbr.rel (%p2899_p11) target bundleno = 2881 (0xb41), region = 100 }
 0xb3a   : > { %2572 = vst [vmem:[#allocation2 + $0x8] sm:$0xff] %v2568_v58  ;;  %v2569_v9 = vadd.f32 %v2898_v17, %v2559_v31  ;;  %v2560_v59 = vmul.f32 %v2897_v46, %v2550_v40  ;;  %v2918_v62 = vpack.c.bf16 (!%p2899_p11), %v2568_v58, %v2567_v50 }
 0xb3c   : > { %2573 = vst [vmem:[#allocation2 + $0x10] sm:$0xff] %v2569_v9  ;;  %v2570_v60 = vadd.f32 %v2898_v17, %v2560_v59  ;;  %2919 = vst [vmem:[#allocation13] sm:$0xff] (!%p2899_p11), %v2918_v62  }
 0xb3e   : > { %2574 = vst [vmem:[#allocation2 + $0x18] sm:$0xff] %v2570_v60  ;;  %v2923_v44 = vpack.c.bf16 (!%p2899_p11), %v2570_v60, %v2569_v9 }
 0xb40   : > { %2925 = vst [vmem:[#allocation13 + $0x8] sm:$0xff] %v2923_v44  }
 0xb41 PF: > { %p3214_p8 = scmp.eq.s32.totalorder %s3851_s21, 1  ;;  %s3651_s1 = smov [#allocation13]  }
 0xb42   : > { %s2605_s18 = sshll.u32 %s3651_s1, 4  ;;  %s2606_s18 = int_to_ptr.vmem [resolvable:$true] %s2605_s18 }
 0xb43   : > { %s3556_s25 = scalar_lea.vmem %s2606_s18, 256  ;;  %p3563_p2 = scmp.lt.s32.totalorder %s2606_s18, %s2606_s18 }
 0xb44   : > { %p3557_p0 = scmp.ne.s32.totalorder %s2606_s18, %s3556_s25  ;;  %p3564_p1 = scmp.lt.s32.totalorder %s3556_s25, %s3556_s25 }
 0xb46   : > { %p3558_p5 = pnand %p3557_p0, %p3214_p8  ;;  %p3565_p13 = por %p3564_p1, %p3563_p2 }
 0xb48   : > { %p3559_p7 = pneg %p3558_p5 }
 0xb4a   : > { %p3566_p12 = pnand %p3565_p13, %p3559_p7 }
 0xb4c   : > { %3569 = shalt.err (!%p3566_p12)
}
 0xb4d   : > { %s4610_s29 = sld [smem:[#allocation31_spill]] }
 0xb53   : > { %s3570_s11 = scalar_lea.hbm %s4610_s29, 256 }
 0xb54   : > { %p3571_p10 = scmp.ne.s32.totalorder %s4610_s29, %s3570_s11  ;;  %p3576_p6 = scmp.lt.u32.totalorder %s3570_s11, %s4610_s29 }
 0xb56   : > { %p3572_p9 = pnand %p3571_p10, %p3214_p8 }
 0xb58   : > { %p3573_p3 = pneg %p3572_p9 }
 0xb5a   : > { %p3578_p4 = pnand %p3576_p6, %p3573_p3 }
 0xb5c   : > { %3581 = shalt.err (!%p3578_p4)
}
 0xb5d   : > { %s3652_s7 = smov 64   ;;  %s3653_s24 = smov 4  }
 0xb5e   : > { %3191 = dma.vmem_to_hbm [thread:$0]  (%p3214_p8), %s2606_s18, 256, %s4610_s29, [#allocation6], %s3652_s7, %s3652_s7, %s3653_s24  }
 0xb5f   : > { %3611 = dma.done.wait (%p3214_p8), [#allocation6], 256  }
 0xb60   : > { %3613 = vsyncadd (%p3214_p8), [#allocation6], 4294967040 }
 0xb61 PF: > { %s4611_s28 = sld [smem:[#allocation20_spill]]  ;;  %s4612_s25 = sld [smem:[#allocation18_spill]] }
 0xb62   : > { %s4613_s26 = sld [smem:[#allocation19_spill]]  ;;  %s4614_s27 = sld [smem:[#allocation21_spill]] }
 0xb67   : > { %p28_p11 = scmp.ge.s32.totalorder %s4611_s28, 4  }
 0xb69   :  { %30 = sbr.rel (!%p28_p11) target bundleno = 18 (0x12), region = 181 }
 0xb70   :  { %2621 = vsyncpa [#allocation5], 1 }
 0xb71   :  { %2623 = vsyncpa [#allocation5 + $0x1], 1 }
 0xb72   :  { %2624 = vsyncpa [#allocation8], 1 }
 0xb73   :  { %2626 = vsyncpa [#allocation8 + $0x1], 1 }
 0xb74   :  { %2627 = vsyncpa [#allocation11], 1 }
 0xb75   :  { %2629 = vsyncpa [#allocation11 + $0x1], 1 }
 0xb76   :  { %2630 = vsyncpa [#allocation6], 1 }
 0xb77   :  { %2632 = vsyncpa [#allocation6 + $0x1], 1 }

</bundles_post_ra>
